<compile_context>
chip_gen: v7x
topology: tpu7x:2x2x1
jax: 0.10.0
libtpu: 0.0.40
codegen_flags: <defaults>
</compile_context>

<pallas_src>
import jax
import jax.numpy as jnp
from jax import lax
from jax.experimental import pallas as pl
from jax.experimental.pallas import tpu as pltpu


_ORDER = ("X", "W1", "W2", "W3", "W4")
# name -> (in_channels, kernel_size, stride)
_CONV_SPECS = {
    "X":  (1, 5, 1),
    "W1": (1, 25, 5),
    "W2": (2, 5, 1),
    "W3": (1, 5, 1),
    "W4": (1, 5, 1),
}
_K_SIZES = {name: cin * k * k for name, (cin, k, _) in _CONV_SPECS.items()}


# ----------------------------------------------------------------------------
# Pallas kernel: five per-segment MXU dots + in-kernel bias add + 160-wide store
# ----------------------------------------------------------------------------
def _fused_kernel(ax_ref, a1_ref, a2_ref, a3_ref, a4_ref,
                  wx_ref, w1_ref, w2_ref, w3_ref, w4_ref,
                  b_ref, o_ref):
    a_refs = (ax_ref, a1_ref, a2_ref, a3_ref, a4_ref)
    w_refs = (wx_ref, w1_ref, w2_ref, w3_ref, w4_ref)
    # Five (m_block, 32) partial results in f32 accumulation, concatenated in
    # VMEM so the HBM store is a single lane-dense 160-wide slab.
    outs = [jnp.dot(a[...], w[...], preferred_element_type=jnp.float32)
            for a, w in zip(a_refs, w_refs)]
    o_ref[...] = (jnp.concatenate(outs, axis=-1) + b_ref[...]).astype(o_ref.dtype)


def _choose_m_block(m, rows_per_image):
    """Rows per grid step.

    Whole images per step so blocks divide M exactly.  Prefer >= 2 grid steps
    (so v7x's two TensorCores both get work); cap rows/step so the bf16 A
    tiles (double-buffered) + weights + f32 output stay well under v7x's
    32 MiB scoped-VMEM default when batch scales.
    """
    cap_rows = 2048                       # ~2048*750*2B*2buf ≈ 6 MiB of A tiles
    if rows_per_image % 8 != 0 or m % rows_per_image != 0:
        # TODO(synk): odd spatial sizes fall back to a single whole-M step.
        return m
    imgs = m // rows_per_image
    imgs_per_step = max(1, min(imgs // 2 if imgs >= 2 else 1,
                               max(1, cap_rows // rows_per_image)))
    while imgs % imgs_per_step != 0:      # keep the grid exact (no partial tile)
        imgs_per_step -= 1
    return imgs_per_step * rows_per_image


def _fused_matmul(patch_mats, ws, bias, m_block):
    """patch_mats[i]: (M, K_i) bf16, ws[i]: (K_i, OC) bf16, bias: (1, 5*OC) f32."""
    m = patch_mats[0].shape[0]
    n_out = bias.shape[1]
    assert m % m_block == 0
    grid = (m // m_block,)

    k_sizes = [p.shape[1] for p in patch_mats]
    in_specs = (
        [pl.BlockSpec((m_block, k), lambda i: (i, 0)) for k in k_sizes]       # A_i
        + [pl.BlockSpec(w.shape, lambda i: (0, 0)) for w in ws]               # W_i
        + [pl.BlockSpec(bias.shape, lambda i: (0, 0))]                        # bias
    )
    oc = ws[0].shape[1]
    flops = 2 * m * sum(k_sizes) * oc
    bytes_accessed = (sum(p.size * p.dtype.itemsize for p in patch_mats)
                      + sum(w.size * w.dtype.itemsize for w in ws)
                      + bias.size * bias.dtype.itemsize
                      + m * n_out * 4)

    return pl.pallas_call(
        _fused_kernel,
        out_shape=jax.ShapeDtypeStruct((m, n_out), jnp.float32),
        grid=grid,
        in_specs=in_specs,
        out_specs=pl.BlockSpec((m_block, n_out), lambda i: (i, 0)),
        compiler_params=pltpu.CompilerParams(
            dimension_semantics=("parallel",)),   # shard row tiles across TCs (v7x)
        cost_estimate=pl.CostEstimate(flops=flops, transcendentals=0,
                                      bytes_accessed=bytes_accessed),
    )(*patch_mats, *ws, bias)


# ----------------------------------------------------------------------------
# Parameter packing (done once at init; parameters are static)
# ----------------------------------------------------------------------------
def pack_params(params, out_channels=32):
    """Per-conv (K_i, OC) bf16 weights (PyTorch OIHW -> (C,KH,KW) rows) + (1, 5*OC) f32 bias."""
    ws = tuple(
        params[name][0].reshape(out_channels, _K_SIZES[name]).T.astype(jnp.bfloat16)
        for name in _ORDER
    )
    bias = jnp.concatenate([params[name][1] for name in _ORDER]
                           ).reshape(1, -1).astype(jnp.float32)
    return ws, bias


def init_params(key, out_channels=32):
    """Kaiming-normal (fan_in, relu) weights, PyTorch-default uniform bias."""
    params = {}
    for name, (cin, k, _) in _CONV_SPECS.items():
        key, k_w, k_b = jax.random.split(key, 3)
        fan_in = cin * k * k
        std = (2.0 / fan_in) ** 0.5
        w = std * jax.random.normal(k_w, (out_channels, cin, k, k), jnp.float32)
        bound = 1.0 / fan_in ** 0.5
        b = jax.random.uniform(k_b, (out_channels,), jnp.float32, -bound, bound)
        params[name] = (w, b)
    return params


# ----------------------------------------------------------------------------
# InputBlock forward: 5 convs + bias + channel concat, fused into one kernel.
# ----------------------------------------------------------------------------
@jax.jit
def input_block_forward(ws, bias, x, w1, w2, w3, w4):
    inputs = {"X": x, "W1": w1, "W2": w2, "W3": w3, "W4": w4}
    n = x.shape[0]

    patch_mats = []
    oh = ow = None
    for name in _ORDER:
        cin, k, s = _CONV_SPECS[name]
        # One XLA data-movement op per input: (N, OH, OW, Cin*KH*KW) with
        # features in (C, KH, KW) order, matching the OIHW weight flattening.
        # bf16 cast first: halves patch-slab HBM bytes; extraction itself is exact.
        p = lax.conv_general_dilated_patches(
            inputs[name].astype(jnp.bfloat16), (k, k), (s, s), "VALID",
            dimension_numbers=("NCHW", "OIHW", "NHWC"))
        if oh is None:
            oh, ow = p.shape[1], p.shape[2]
        else:
            assert (oh, ow) == (p.shape[1], p.shape[2]), "spatial mismatch for concat"
        patch_mats.append(p.reshape(n * oh * ow, cin * k * k))

    m = n * oh * ow
    m_block = _choose_m_block(m, oh * ow)
    out_flat = _fused_matmul(patch_mats, ws, bias, m_block)   # (M, 5*OC), NHWC order

    n_out = bias.shape[1]
    # Single layout op at the API boundary back to PyTorch NCHW.
    # (Drop this transpose if the downstream consumer accepts NHWC.)
    return out_flat.reshape(n, oh, ow, n_out).transpose(0, 3, 1, 2)


# ----------------------------------------------------------------------------
# Pure-JAX reference (lax.conv_general_dilated) for the correctness check.
# ----------------------------------------------------------------------------
def _reference_forward(params, x, w1, w2, w3, w4):
    inputs = {"X": x, "W1": w1, "W2": w2, "W3": w3, "W4": w4}
    outs = []
    for name in _ORDER:
        _, _, stride = _CONV_SPECS[name]
        w, b = params[name]
        y = lax.conv_general_dilated(
            inputs[name], w, (stride, stride), "VALID",
            dimension_numbers=("NCHW", "OIHW", "NCHW"))
        outs.append(y + b[None, :, None, None])
    return jnp.concatenate(outs, axis=1)


def _quantize_bf16(a):
    return a.astype(jnp.bfloat16).astype(jnp.float32)


if __name__ == "__main__":
    key = jax.random.PRNGKey(0)
    k_p, k_x, k_w1, k_w2, k_w3, k_w4 = jax.random.split(key, 6)

    out_channels = 32
    params = init_params(k_p, out_channels=out_channels)
    ws, bias = pack_params(params, out_channels=out_channels)

    # Shapes chosen so all conv outputs share a 12x12 spatial size (required for
    # the channel concat): X/W2/W3/W4 at 16x16 (k=5, s=1), W1 at 80x80 (k=25, s=5).
    batch = 2
    x = jax.random.normal(k_x, (batch, 1, 16, 16), jnp.float32)
    w1 = jax.random.normal(k_w1, (batch, 1, 80, 80), jnp.float32)
    w2 = jax.random.normal(k_w2, (batch, 2, 16, 16), jnp.float32)
    w3 = jax.random.normal(k_w3, (batch, 1, 16, 16), jnp.float32)
    w4 = jax.random.normal(k_w4, (batch, 1, 16, 16), jnp.float32)

    out = jax.block_until_ready(input_block_forward(ws, bias, x, w1, w2, w3, w4))
    assert out.shape == (batch, 5 * out_channels, 12, 12), out.shape

    # Reference with the same bf16 input/weight quantization (kernel accumulates
    # in f32, so the only difference vs. this reference is summation order).
    params_q = {name: (_quantize_bf16(w), b) for name, (w, b) in params.items()}
    ref = jax.block_until_ready(_reference_forward(
        params_q, _quantize_bf16(x), _quantize_bf16(w1), _quantize_bf16(w2),
        _quantize_bf16(w3), _quantize_bf16(w4)))
    max_err = float(jnp.max(jnp.abs(out - ref)))
    assert jnp.allclose(out, ref, rtol=1e-2, atol=1e-2), max_err

    print("KERNEL_OK")
</pallas_src>

<mosaic_0001>
module attributes {stable_mosaic.version = 11 : i64} {
  func.func @_fused_kernel(%arg0: i32, %arg1: memref<144x25xbf16, #tpu.memory_space<vmem>>, %arg2: memref<144x625xbf16, #tpu.memory_space<vmem>>, %arg3: memref<144x50xbf16, #tpu.memory_space<vmem>>, %arg4: memref<144x25xbf16, #tpu.memory_space<vmem>>, %arg5: memref<144x25xbf16, #tpu.memory_space<vmem>>, %arg6: memref<25x32xbf16, #tpu.memory_space<vmem>>, %arg7: memref<625x32xbf16, #tpu.memory_space<vmem>>, %arg8: memref<50x32xbf16, #tpu.memory_space<vmem>>, %arg9: memref<25x32xbf16, #tpu.memory_space<vmem>>, %arg10: memref<25x32xbf16, #tpu.memory_space<vmem>>, %arg11: memref<1x160xf32, #tpu.memory_space<vmem>>, %arg12: memref<144x160xf32, #tpu.memory_space<vmem>>) attributes {dimension_semantics = [#tpu.dimension_semantics<parallel>], iteration_bounds = array<i64: 2>, scalar_prefetch = 0 : i64, scratch_operands = 0 : i64, tpu.core_type = #tpu.core_type<tc>, window_params = [{transform_indices = @transform_0, window_bounds = array<i64: 144, 25>}, {transform_indices = @transform_1, window_bounds = array<i64: 144, 625>}, {transform_indices = @transform_2, window_bounds = array<i64: 144, 50>}, {transform_indices = @transform_3, window_bounds = array<i64: 144, 25>}, {transform_indices = @transform_4, window_bounds = array<i64: 144, 25>}, {pipeline_mode = #tpu.pipeline_mode<synchronous>, transform_indices = @transform_5, window_bounds = array<i64: 25, 32>}, {pipeline_mode = #tpu.pipeline_mode<synchronous>, transform_indices = @transform_6, window_bounds = array<i64: 625, 32>}, {pipeline_mode = #tpu.pipeline_mode<synchronous>, transform_indices = @transform_7, window_bounds = array<i64: 50, 32>}, {pipeline_mode = #tpu.pipeline_mode<synchronous>, transform_indices = @transform_8, window_bounds = array<i64: 25, 32>}, {pipeline_mode = #tpu.pipeline_mode<synchronous>, transform_indices = @transform_9, window_bounds = array<i64: 25, 32>}, {pipeline_mode = #tpu.pipeline_mode<synchronous>, transform_indices = @transform_10, window_bounds = array<i64: 1, 160>}, {transform_indices = @transform_11, window_bounds = array<i64: 144, 160>}]} {
    %c0 = arith.constant 0 : index
    %c0_0 = arith.constant 0 : index
    %0 = vector.load %arg1[%c0, %c0_0] : memref<144x25xbf16, #tpu.memory_space<vmem>>, vector<144x25xbf16>
    %c0_1 = arith.constant 0 : index
    %c0_2 = arith.constant 0 : index
    %1 = vector.load %arg6[%c0_1, %c0_2] : memref<25x32xbf16, #tpu.memory_space<vmem>>, vector<25x32xbf16>
    %cst = arith.constant dense<0.000000e+00> : vector<144x32xf32>
    %2 = tpu.matmul %0, %1, %cst {dimension_numbers = #tpu.dot_dimension_numbers<[1], [0], [0], [1], [0, 0, 1, 1], [], []>} : vector<144x25xbf16>, vector<25x32xbf16>, vector<144x32xf32> -> vector<144x32xf32>
    %c0_3 = arith.constant 0 : index
    %c0_4 = arith.constant 0 : index
    %3 = vector.load %arg2[%c0_3, %c0_4] : memref<144x625xbf16, #tpu.memory_space<vmem>>, vector<144x625xbf16>
    %c0_5 = arith.constant 0 : index
    %c0_6 = arith.constant 0 : index
    %4 = vector.load %arg7[%c0_5, %c0_6] : memref<625x32xbf16, #tpu.memory_space<vmem>>, vector<625x32xbf16>
    %cst_7 = arith.constant dense<0.000000e+00> : vector<144x32xf32>
    %5 = tpu.matmul %3, %4, %cst_7 {dimension_numbers = #tpu.dot_dimension_numbers<[1], [0], [0], [1], [0, 0, 1, 1], [], []>} : vector<144x625xbf16>, vector<625x32xbf16>, vector<144x32xf32> -> vector<144x32xf32>
    %c0_8 = arith.constant 0 : index
    %c0_9 = arith.constant 0 : index
    %6 = vector.load %arg3[%c0_8, %c0_9] : memref<144x50xbf16, #tpu.memory_space<vmem>>, vector<144x50xbf16>
    %c0_10 = arith.constant 0 : index
    %c0_11 = arith.constant 0 : index
    %7 = vector.load %arg8[%c0_10, %c0_11] : memref<50x32xbf16, #tpu.memory_space<vmem>>, vector<50x32xbf16>
    %cst_12 = arith.constant dense<0.000000e+00> : vector<144x32xf32>
    %8 = tpu.matmul %6, %7, %cst_12 {dimension_numbers = #tpu.dot_dimension_numbers<[1], [0], [0], [1], [0, 0, 1, 1], [], []>} : vector<144x50xbf16>, vector<50x32xbf16>, vector<144x32xf32> -> vector<144x32xf32>
    %c0_13 = arith.constant 0 : index
    %c0_14 = arith.constant 0 : index
    %9 = vector.load %arg4[%c0_13, %c0_14] : memref<144x25xbf16, #tpu.memory_space<vmem>>, vector<144x25xbf16>
    %c0_15 = arith.constant 0 : index
    %c0_16 = arith.constant 0 : index
    %10 = vector.load %arg9[%c0_15, %c0_16] : memref<25x32xbf16, #tpu.memory_space<vmem>>, vector<25x32xbf16>
    %cst_17 = arith.constant dense<0.000000e+00> : vector<144x32xf32>
    %11 = tpu.matmul %9, %10, %cst_17 {dimension_numbers = #tpu.dot_dimension_numbers<[1], [0], [0], [1], [0, 0, 1, 1], [], []>} : vector<144x25xbf16>, vector<25x32xbf16>, vector<144x32xf32> -> vector<144x32xf32>
    %c0_18 = arith.constant 0 : index
    %c0_19 = arith.constant 0 : index
    %12 = vector.load %arg5[%c0_18, %c0_19] : memref<144x25xbf16, #tpu.memory_space<vmem>>, vector<144x25xbf16>
    %c0_20 = arith.constant 0 : index
    %c0_21 = arith.constant 0 : index
    %13 = vector.load %arg10[%c0_20, %c0_21] : memref<25x32xbf16, #tpu.memory_space<vmem>>, vector<25x32xbf16>
    %cst_22 = arith.constant dense<0.000000e+00> : vector<144x32xf32>
    %14 = tpu.matmul %12, %13, %cst_22 {dimension_numbers = #tpu.dot_dimension_numbers<[1], [0], [0], [1], [0, 0, 1, 1], [], []>} : vector<144x25xbf16>, vector<25x32xbf16>, vector<144x32xf32> -> vector<144x32xf32>
    %15 = tpu.concatenate %2, %5, %8, %11, %14 in 1 : vector<144x32xf32>, vector<144x32xf32>, vector<144x32xf32>, vector<144x32xf32>, vector<144x32xf32> -> vector<144x160xf32>
    %c0_23 = arith.constant 0 : index
    %c0_24 = arith.constant 0 : index
    %16 = vector.load %arg11[%c0_23, %c0_24] : memref<1x160xf32, #tpu.memory_space<vmem>>, vector<1x160xf32>
    %17 = vector.broadcast %16 : vector<1x160xf32> to vector<144x160xf32>
    %18 = arith.addf %15, %17 : vector<144x160xf32>
    %c0_25 = arith.constant 0 : index
    %c0_26 = arith.constant 0 : index
    %19 = vector.load %arg12[%c0_25, %c0_26] : memref<144x160xf32, #tpu.memory_space<vmem>>, vector<144x160xf32>
    tpu.vector_store %arg12[%c0_25, %c0_26], %18 {strides = array<i32>} : memref<144x160xf32, #tpu.memory_space<vmem>>, vector<144x160xf32>,
    return
  }
  func.func @transform_0(%arg0: i32) -> (i32, i32) {
    %c0_i32 = arith.constant 0 : i32
    %c0_i32_0 = arith.constant 0 : i32
    return %arg0, %c0_i32 : i32, i32
  }
  func.func @transform_1(%arg0: i32) -> (i32, i32) {
    %c0_i32 = arith.constant 0 : i32
    %c0_i32_0 = arith.constant 0 : i32
    return %arg0, %c0_i32 : i32, i32
  }
  func.func @transform_2(%arg0: i32) -> (i32, i32) {
    %c0_i32 = arith.constant 0 : i32
    %c0_i32_0 = arith.constant 0 : i32
    return %arg0, %c0_i32 : i32, i32
  }
  func.func @transform_3(%arg0: i32) -> (i32, i32) {
    %c0_i32 = arith.constant 0 : i32
    %c0_i32_0 = arith.constant 0 : i32
    return %arg0, %c0_i32 : i32, i32
  }
  func.func @transform_4(%arg0: i32) -> (i32, i32) {
    %c0_i32 = arith.constant 0 : i32
    %c0_i32_0 = arith.constant 0 : i32
    return %arg0, %c0_i32 : i32, i32
  }
  func.func @transform_5(%arg0: i32) -> (i32, i32) {
    %c0_i32 = arith.constant 0 : i32
    %c0_i32_0 = arith.constant 0 : i32
    %c0_i32_1 = arith.constant 0 : i32
    return %c0_i32, %c0_i32_0 : i32, i32
  }
  func.func @transform_6(%arg0: i32) -> (i32, i32) {
    %c0_i32 = arith.constant 0 : i32
    %c0_i32_0 = arith.constant 0 : i32
    %c0_i32_1 = arith.constant 0 : i32
    return %c0_i32, %c0_i32_0 : i32, i32
  }
  func.func @transform_7(%arg0: i32) -> (i32, i32) {
    %c0_i32 = arith.constant 0 : i32
    %c0_i32_0 = arith.constant 0 : i32
    %c0_i32_1 = arith.constant 0 : i32
    return %c0_i32, %c0_i32_0 : i32, i32
  }
  func.func @transform_8(%arg0: i32) -> (i32, i32) {
    %c0_i32 = arith.constant 0 : i32
    %c0_i32_0 = arith.constant 0 : i32
    %c0_i32_1 = arith.constant 0 : i32
    return %c0_i32, %c0_i32_0 : i32, i32
  }
  func.func @transform_9(%arg0: i32) -> (i32, i32) {
    %c0_i32 = arith.constant 0 : i32
    %c0_i32_0 = arith.constant 0 : i32
    %c0_i32_1 = arith.constant 0 : i32
    return %c0_i32, %c0_i32_0 : i32, i32
  }
  func.func @transform_10(%arg0: i32) -> (i32, i32) {
    %c0_i32 = arith.constant 0 : i32
    %c0_i32_0 = arith.constant 0 : i32
    %c0_i32_1 = arith.constant 0 : i32
    return %c0_i32, %c0_i32_0 : i32, i32
  }
  func.func @transform_11(%arg0: i32) -> (i32, i32) {
    %c0_i32 = arith.constant 0 : i32
    %c0_i32_0 = arith.constant 0 : i32
    return %arg0, %c0_i32 : i32, i32
  }
}

</mosaic_0001>

<bundles_post_ra>
// kernel: input_block_forward.1
= control target key start
LH: loop header
LB: loop body
LE: loop exit
PB: predicated region body
PF: predicated region fallthrough
CT: control target
= control target key end

     0   :  { %s3616_s17 = smov 0   ;;  %s4428_s0 = inlined_call_operand.vmem [shape: bf16[288,25], index: 0, kind: input, shape index: {}]   ;;  %s4429_s1 = inlined_call_operand.vmem [shape: bf16[288,625], index: 1, kind: input, shape index: {}]   ;;  %s4430_s2 = inlined_call_operand.vmem [shape: bf16[288,50], index: 2, kind: input, shape index: {}]   ;;  %s4431_s3 = inlined_call_operand.vmem [shape: bf16[288,25], index: 3, kind: input, shape index: {}]   ;;  %s4432_s4 = inlined_call_operand.vmem [shape: bf16[288,25], index: 4, kind: input, shape index: {}]   ;;  %s4433_s5 = inlined_call_operand.vmem [shape: bf16[25,32], index: 5, kind: input, shape index: {}]   ;;  %s4434_s6 = inlined_call_operand.vmem [shape: bf16[625,32], index: 6, kind: input, shape index: {}]   ;;  %s4435_s7 = inlined_call_operand.vmem [shape: bf16[50,32], index: 7, kind: input, shape index: {}]   ;;  %s4436_s8 = inlined_call_operand.vmem [shape: bf16[25,32], index: 8, kind: input, shape index: {}]   ;;  %s4437_s9 = inlined_call_operand.vmem [shape: bf16[25,32], index: 9, kind: input, shape index: {}]   ;;  %s4438_s10 = inlined_call_operand.vmem [shape: f32[1,160], index: 10, kind: input, shape index: {}]   ;;  %s4439_s11 = inlined_call_operand.vmem [shape: f32[288,160], index: 11, kind: output, shape index: {}]  }
   0x1 LB: > { %s2762_s18 = sadd.s32 4294967295, %s3547_s17   ;;  %p2766_p0 = scmp.ge.s32.totalorder %s3547_s17, 1  ;;  %s3547_s17 = sphi %s3616_s17, %s21_s17  }
   0x2   : > { %p383_p1 = scmp.lt.s32.totalorder %s3547_s17, 3 }
   0x4   : > { %p384_p2 = pnand %p2766_p0, %p383_p1 }
   0x5   : > { %v3392_v0 = vld [vmem:[%s4433_s5] sm:$0xff] (!%p384_p2)   ;;  %v3549_v1 = vmov (!%p384_p2), 0.0   ;;  %v3393_v2 = vld [vmem:[%s4433_s5 + $0x8] sm:$0x1f] (!%p384_p2)   ;;  %vm590_vm0 = vcmask (!%p384_p2), 1043456   ;;  %vm591_vm1 = vcmask (!%p384_p2), 1044480  }
   0x6   : > { %387 = sbr.rel (%p384_p2) target bundleno = 599 (0x257), region = 64  ;;  %3372 = vmatprep.subr.bf16.mxu1 (!%p384_p2), %v3549_v1  ;;  %3156 = vmatprep.subr.bf16.mxu0 (!%p384_p2), %v3549_v1  ;;  %v3550_v3 = vmov (!%p384_p2), 65535   ;;  %vm3551_vm2 = vmmov (!%p384_p2), 0   ;;  %v3394_v6 = vld [vmem:[%s4434_s6 + $0x40] sm:$0xff] (!%p384_p2)   ;;  %vm562_vm3 = vcmask (!%p384_p2), 203776   ;;  %v3400_v11 = vld [vmem:[%s4434_s6 + $0x48] sm:$0xff] (!%p384_p2)  }
   0x7   : > { %3374 = vmatpush3.bf16.msra.mxu1 (!%p384_p2), %v3392_v0  ;;  %3157 = vmatpush3.bf16.msra.mxu0 (!%p384_p2), %v3392_v0  ;;  %v592_v4 = vsel (!%p384_p2), %vm590_vm0, 4294967295, %v3550_v3  ;;  %s445_s23 = smul.u32 (!%p384_p2), 18, %s2762_s18  ;;  %v3398_v8 = vld [vmem:[%s4434_s6 + $0xc0] sm:$0xff] (!%p384_p2)   ;;  %v3401_v12 = vld [vmem:[%s4434_s6 + $0xc8] sm:$0xff] (!%p384_p2)   ;;  %v3406_v19 = vld [vmem:[%s4434_s6 + $0xd0] sm:$0xff] (!%p384_p2)   ;;  %vm1325_vm4 = vcmask (!%p384_p2), 1040384  }
   0x8   : > { %3373 = vmatprep.subr.bf16.mxu1 (!%p384_p2), %v3549_v1  ;;  %3158 = vmatprep.subr.bf16.mxu0 (!%p384_p2), %v3549_v1  ;;  %v3634_v5 = vsel (!%p384_p2), %vm591_vm1, %v592_v4, 0  ;;  %v3397_v9 = vld [vmem:[%s4434_s6] sm:$0xff] (!%p384_p2)   ;;  %v3402_v15 = vld [vmem:[%s4434_s6 + $0x8] sm:$0xff] (!%p384_p2)   ;;  %v3407_v20 = vld [vmem:[%s4434_s6 + $0x50] sm:$0xff] (!%p384_p2)   ;;  %vm1737_vm5 = vcmask (!%p384_p2), 408576   ;;  %vm1297_vm6 = vcmask (!%p384_p2), 924672  }
   0x9   : > { %3160 = vmatprep.mubr.msk.bf16.mxu0 (!%p384_p2), %vm3551_vm2, %v3549_v1  ;;  %3176 = vmatprep.mubr.msk.bf16.mxu1 (!%p384_p2), %vm3551_vm2, %v3549_v1  ;;  %v595_v7 = vand.u32 (!%p384_p2), %v3393_v2, %v3634_v5  ;;  %p446_p3 = scmp.lt.s32.totalorder (!%p384_p2), %s445_s23, 35  ;;  %v3399_v10 = vld [vmem:[%s4434_s6 + $0x80] sm:$0xff] (!%p384_p2)   ;;  %v3403_v16 = vld [vmem:[%s4434_s6 + $0x88] sm:$0xff] (!%p384_p2)   ;;  %v3408_v21 = vld [vmem:[%s4434_s6 + $0x90] sm:$0xff] (!%p384_p2)   ;;  %vm2515_vm7 = vcmask (!%p384_p2), 261120   ;;  %vm2534_vm8 = vcmask (!%p384_p2), 523264  }
   0xa   : > { %v3409_v22 = vld [vmem:[%s4434_s6 + $0x10] sm:$0xff] (!%p384_p2)   ;;  %v3410_v23 = vld [vmem:[%s4434_s6 + $0xd8] sm:$0xff] (!%p384_p2)   ;;  %v3416_v29 = vld [vmem:[%s4434_s6 + $0xe0] sm:$0xff] (!%p384_p2)   ;;  %vm2553_vm9 = vcmask (!%p384_p2), 785408  }
   0xb   : > { %3375 = vmatpush3.bf16.msra.mxu1 (!%p384_p2), %v595_v7  ;;  %3159 = vmatpush3.bf16.msra.mxu0 (!%p384_p2), %v595_v7  ;;  %v3411_v24 = vld [vmem:[%s4434_s6 + $0x98] sm:$0xff] (!%p384_p2)   ;;  %v3417_v30 = vld [vmem:[%s4434_s6 + $0xa0] sm:$0xff] (!%p384_p2)   ;;  %v3420_v33 = vld [vmem:[%s4434_s6 + $0xe8] sm:$0xff] (!%p384_p2)  }
   0xc   : > { %2964 = vmatprep.subr.bf16.mxu1 (!%p384_p2), %v3394_v6  ;;  %3034 = vmatprep.subr.bf16.mxu0 (!%p384_p2), %v3398_v8  ;;  %v3412_v25 = vld [vmem:[%s4434_s6 + $0x58] sm:$0xff] (!%p384_p2)   ;;  %v3418_v31 = vld [vmem:[%s4434_s6 + $0x60] sm:$0xff] (!%p384_p2)   ;;  %v3421_v34 = vld [vmem:[%s4434_s6 + $0xa8] sm:$0xff] (!%p384_p2)  }
   0xd   : > { %s4441_s23 = smov (!%p446_p3, %s445_s23), 35  ;;  %v3413_v26 = vld [vmem:[%s4434_s6 + $0x18] sm:$0xff]   ;;  %v3419_v32 = vld [vmem:[%s4434_s6 + $0x20] sm:$0xff]   ;;  %v3424_v37 = vld [vmem:[%s4434_s6 + $0x68] sm:$0xff]  }
   0xe   : > { %s3650_s28 = sshll.u32 %s4441_s23, 2  ;;  %s3376_s27 = smul.u32 20, %s4441_s23  ;;  %v3425_v38 = vld [vmem:[%s4434_s6 + $0xf0] sm:$0xff]   ;;  %v3426_v39 = vld [vmem:[%s4434_s6 + $0x28] sm:$0xff]   ;;  %v3428_v41 = vld [vmem:[%s4434_s6 + $0xf8] sm:$0xff]  }
   0xf   : > { %s3662_s16 = scalar_lea.vmem %s4428_s0, %s3650_s28  ;;  %v3427_v40 = vld [vmem:[%s4434_s6 + $0xb0] sm:$0xff]   ;;  %v3430_v43 = vld [vmem:[%s4434_s6 + $0xb8] sm:$0xff]   ;;  %v3444_v54 = vld [vmem:[%s4434_s6 + $0x100] sm:$0xff]   ;;  %s3878_s15 = scalar_lea.vmem %s4431_s3, %s3650_s28 }
  0x10   : > { %v3395_v13 = vld [vmem:[%s3662_s16] sm:$0xff]   ;;  %v3404_v17 = vld [vmem:[%s3662_s16 + $0x8] sm:$0xff]   ;;  %v3414_v27 = vld [vmem:[%s3662_s16 + $0x10] sm:$0xff]   ;;  %s3765_s22 = scalar_lea.vmem %s4429_s1, %s3376_s27  ;;  %s3854_s27 = scalar_lea.vmem %s4430_s2, %s3650_s28 }
  0x11   : > { %v3396_v14 = vld [vmem:[%s3662_s16 + $0x20] sm:$0xff]   ;;  %3161 = vmatmul.mubr.msk.bf16.vlgmr.msra.gmra.mrb[0].mxu0 %vm562_vm3, %v3395_v13  ;;  %v3405_v18 = vld [vmem:[%s3662_s16 + $0x28] sm:$0xff]   ;;  %v3415_v28 = vld [vmem:[%s3662_s16 + $0x30] sm:$0xff]   ;;  %s3889_s19 = scalar_lea.vmem %s4432_s4, %s3650_s28  ;;  %s2952_s14 = sshll.u32 %s4441_s23, 4 }
  0x12   : > { %3177 = vmatmul.mubr.msk.bf16.vlgmr.msra.gmra.mrb[0].mxu1 %vm562_vm3, %v3396_v14  ;;  %3035 = vmatpush3.bf16.msra.mxu0 %v3399_v10  ;;  %v3422_v35 = vld [vmem:[%s3662_s16 + $0x18] sm:$0xff]   ;;  %v3429_v42 = vld [vmem:[%s4434_s6 + $0x70] sm:$0xff]   ;;  %v3434_v46 = vld [vmem:[%s3765_s22 + $0xc] ss:$20 sps:$4 sm:$0xff]   ;;  %s4184_s18 = scalar_lea.vmem %s4439_s11, %s2952_s14  ;;  %s3555_s23 = smov 96  }
  0x13   : > { %2965 = vmatpush3.bf16.msra.mxu1 %v3397_v9  ;;  %3036 = vmatprep.subr.bf16.mxu0 %v3401_v12  ;;  %v3423_v36 = vld [vmem:[%s3662_s16 + $0x38] sm:$0xff]   ;;  %v3431_v44 = vld [vmem:[%s4434_s6 + $0x30] sm:$0xff]   ;;  %v3435_v47 = vld [vmem:[%s3662_s16 + $0x40] sm:$0xff]  }
  0x14   : > { %2966 = vmatprep.subr.bf16.mxu1 %v3400_v11  ;;  %3164 = vmatprep.mubr.msk.bf16.mxu0 %vm3551_vm2, %v3549_v1  ;;  %v3432_v45 = vld [vmem:[%s3765_s22 + $0x8] ss:$20 sps:$4 sm:$0xff]   ;;  %v3440_v50 = vld [vmem:[%s3765_s22 + $0x4] ss:$20 sps:$4 sm:$0xff]   ;;  %v3438_v52 = vld [vmem:[%s3765_s22] ss:$20 sps:$4 sm:$0xff]  }
  0x15   : > { %3180 = vmatprep.mubr.msk.bf16.mxu1 %vm3551_vm2, %v3549_v1  ;;  %v3436_v48 = vld [vmem:[%s4434_s6 + $0x78] sm:$0xff]   ;;  %v3441_v51 = vld [vmem:[%s3765_s22 + $0x34] ss:$20 sps:$4 sm:$0xff]   ;;  %v3443_v53 = vld [vmem:[%s3765_s22 + $0x30] ss:$20 sps:$4 sm:$0xff]  }
  0x16   : > { %3037 = vmatpush3.bf16.msra.mxu0 %v3403_v16  ;;  %v3437_v49 = vld [vmem:[%s4434_s6 + $0x38] sm:$0xff]   ;;  %v3445_v55 = vld [vmem:[%s3765_s22 + $0x2c] ss:$20 sps:$4 sm:$0xff]   ;;  %v3452_v60 = vld [vmem:[%s3765_s22 + $0x54] ss:$20 sps:$4 sm:$0xff]   ;;  %v3552_v16 = vmov 0  }
  0x17   : > { %2967 = vmatpush3.bf16.msra.mxu1 %v3402_v15  ;;  %3038 = vmatprep.subr.bf16.mxu0 %v3406_v19  ;;  %v3447_v56 = vld [vmem:[%s3765_s22 + $0x5c] ss:$20 sps:$4 sm:$0xff]   ;;  %v3451_v57 = vld [vmem:[%s4434_s6 + $0x108] sm:$0xff]   ;;  %v3454_v61 = vld [vmem:[%s3765_s22 + $0x84] ss:$20 sps:$4 sm:$0xff]  }
  0x18   : > { %2968 = vmatprep.subr.bf16.mxu1 %v3407_v20  ;;  %v3449_v58 = vld [vmem:[%s3765_s22 + $0x28] ss:$20 sps:$4 sm:$0xff]   ;;  %v3450_v59 = vld [vmem:[%s3765_s22 + $0x58] ss:$20 sps:$4 sm:$0xff]   ;;  %v3458_v62 = vld [vmem:[%s4434_s6 + $0x110] sm:$0xff]  }
  0x19   : > { %3165 = vmatmul.mubr.msk.bf16.gmra.mrb[4].mxu0 %vm562_vm3, %v3404_v17  ;;  %v3466_v63 = vld [vmem:[%s4435_s7] sm:$0xff]   ;;  %v3465_v0 = vld [vmem:[%s4434_s6 + $0x118] sm:$0xff]   ;;  %v3481_v8 = vld [vmem:[%s4435_s7 + $0x8] sm:$0xff]   ;;  %v1327_v17 = vsel %vm1325_vm4, 65535, %v3552_v16 }
  0x1a   : > { %3181 = vmatmul.mubr.msk.bf16.gmra.mrb[4].mxu1 %vm562_vm3, %v3405_v18  ;;  %3039 = vmatpush3.bf16.msra.mxu0 %v3408_v21  ;;  %v3456_v2 = vld [vmem:[%s3765_s22 + $0x50] ss:$20 sps:$4 sm:$0xff]   ;;  %v3457_v3 = vld [vmem:[%s3765_s22 + $0x80] ss:$20 sps:$4 sm:$0xff]   ;;  %v3480_v9 = vld [vmem:[%s4434_s6 + $0x128] sm:$0xff]  }
  0x1b   : > { %2969 = vmatpush3.bf16.msra.mxu1 %v3409_v22  ;;  %3040 = vmatprep.subr.bf16.mxu0 %v3410_v23  ;;  %v3459_v4 = vld [vmem:[%s3765_s22 + $0x7c] ss:$20 sps:$4 sm:$0xff]   ;;  %v3461_v6 = vld [vmem:[%s3765_s22 + $0xac] ss:$20 sps:$4 sm:$0xff]   ;;  %v3467_v12 = vld [vmem:[%s3765_s22 + $0xa4] ss:$20 sps:$4 sm:$0xff]  }
  0x1c   : > { %2970 = vmatprep.subr.bf16.mxu1 %v3412_v25  ;;  %3168 = vmatprep.mubr.msk.bf16.mxu0 %vm3551_vm2, %v3549_v1  ;;  %v3473_v7 = vld [vmem:[%s4434_s6 + $0x120] sm:$0xff]   ;;  %v3463_v10 = vld [vmem:[%s3765_s22 + $0x78] ss:$20 sps:$4 sm:$0xff]   ;;  %v3464_v11 = vld [vmem:[%s3765_s22 + $0xa8] ss:$20 sps:$4 sm:$0xff]  }
  0x1d   : > { %3184 = vmatprep.mubr.msk.bf16.mxu1 %vm3551_vm2, %v3549_v1  ;;  %v3469_v13 = vld [vmem:[%s3765_s22 + $0xd4] ss:$20 sps:$4 sm:$0xff]   ;;  %v3496_v18 = vld [vmem:[%s4434_s6 + $0x138] ss:$0 sps:$4 sm:$0x11]  }
  0x1e   : > { %3041 = vmatpush3.bf16.msra.mxu0 %v3411_v24  ;;  %v3488_v14 = vld [vmem:[%s4434_s6 + $0x130] sm:$0xff]   ;;  %v3497_v19 = vld [vmem:[%s4435_s7 + $0x18] ss:$0 sps:$4 sm:$0x11]   ;;  %v1329_v22 = vand.u32 %v3496_v18, %v1327_v17  ;;  %v3474_v24 = vld [vmem:[%s3765_s22 + $0xcc] ss:$20 sps:$4 sm:$0xff]  }
  0x1f   : > { %2971 = vmatpush3.bf16.msra.mxu1 %v3413_v26  ;;  %3042 = vmatprep.subr.bf16.mxu0 %v3416_v29  ;;  %v3495_v15 = vld [vmem:[%s4435_s7 + $0x10] sm:$0xff]   ;;  %v1766_v23 = vsel %vm1325_vm4, %v3497_v19, 0  ;;  %v3478_v26 = vld [vmem:[%s3765_s22 + $0xc8] ss:$20 sps:$4 sm:$0xff]   ;;  %v3484_v29 = vld [vmem:[%s3765_s22 + $0x124] ss:$20 sps:$4 sm:$0xff]  }
  0x20   : > { %2972 = vmatprep.subr.bf16.mxu1 %v3418_v31  ;;  %v3471_v20 = vld [vmem:[%s3765_s22 + $0xa0] ss:$20 sps:$4 sm:$0xff]   ;;  %v3472_v21 = vld [vmem:[%s3765_s22 + $0xd0] ss:$20 sps:$4 sm:$0xff]  }
  0x21   : > { %3169 = vmatmul.mubr.msk.bf16.gmra.mrb[8].mxu0 %vm562_vm3, %v3414_v27  ;;  %v3476_v25 = vld [vmem:[%s3765_s22 + $0xfc] ss:$20 sps:$4 sm:$0xff]   ;;  %v3479_v27 = vld [vmem:[%s3765_s22 + $0xf8] ss:$20 sps:$4 sm:$0xff]   ;;  %v3487_v31 = vld [vmem:[%s3765_s22 + $0x120] ss:$20 sps:$4 sm:$0xff]  }
  0x22   : > { %3185 = vmatmul.mubr.msk.bf16.gmra.mrb[8].mxu1 %vm562_vm3, %v3415_v28  ;;  %3043 = vmatpush3.bf16.msra.mxu0 %v3417_v30  ;;  %v3482_v28 = vld [vmem:[%s3765_s22 + $0xf4] ss:$20 sps:$4 sm:$0xff]   ;;  %v3486_v30 = vld [vmem:[%s3765_s22 + $0xf0] ss:$20 sps:$4 sm:$0xff]  }
  0x23   : > { %3172 = vmatprep.mubr.msk.bf16.mxu0 %vm3551_vm2, %v3549_v1  ;;  %2973 = vmatpush3.bf16.msra.mxu1 %v3419_v32  ;;  %v3489_v32 = vld [vmem:[%s3765_s22 + $0x11c] ss:$20 sps:$4 sm:$0xff]  }
  0x24   : > { %3044 = vmatprep.subr.bf16.mxu0 %v3420_v33  ;;  %3188 = vmatprep.mubr.msk.bf16.mxu1 %vm3551_vm2, %v3549_v1  ;;  %v3491_v33 = vld [vmem:[%s3765_s22 + $0x14c] ss:$20 sps:$4 sm:$0xff]  }
  0x25   : > { %2974 = vmatprep.subr.bf16.mxu1 %v3424_v37  ;;  %v3500_v37 = vld [vmem:[%s3765_s22 + $0x140] ss:$20 sps:$4 sm:$0xff]  }
  0x26   : > { %3045 = vmatpush3.bf16.msra.mxu0 %v3421_v34  ;;  %v3493_v34 = vld [vmem:[%s3765_s22 + $0x118] ss:$20 sps:$4 sm:$0xff]  }
  0x27   : > { %3046 = vmatprep.subr.bf16.mxu0 %v3425_v38  ;;  %2975 = vmatpush3.bf16.msra.mxu1 %v3426_v39  ;;  %v3501_v38 = vld [vmem:[%s3854_s27] sm:$0xff]  }
  0x28   : > { %2976 = vmatprep.subr.bf16.mxu1 %v3429_v42  ;;  %v3527_v39 = vld [vmem:[%s4437_s9] sm:$0xff]  }
  0x29   : > { %3173 = vmatmul.mubr.msk.bf16.gmra.mrb[12].mxu0 %vm562_vm3, %v3422_v35  ;;  %v3494_v35 = vld [vmem:[%s3765_s22 + $0x148] ss:$20 sps:$4 sm:$0xff]   ;;  %v3504_v42 = vld [vmem:[%s4436_s8] sm:$0xff]  }
  0x2a   : > { %3189 = vmatmul.mubr.msk.bf16.gmra.mrb[12].mxu1 %vm562_vm3, %v3423_v36  ;;  %3047 = vmatpush3.bf16.msra.mxu0 %v3427_v40  ;;  %v3498_v36 = vld [vmem:[%s3765_s22 + $0x144] ss:$20 sps:$4 sm:$0xff]  }
  0x2b   : > { %3048 = vmatprep.subr.bf16.mxu0 %v3428_v41  ;;  %3192 = vmatprep.mubr.msk.bf16.mxu1 %vm3551_vm2, %v3549_v1  ;;  %v3502_v40 = vld [vmem:[%s3765_s22 + $0x10] ss:$20 sps:$4 sm:$0xff]   ;;  %v3503_v41 = vld [vmem:[%s3854_s27 + $0x8] sm:$0xff]  }
  0x2c   : > { %2977 = vmatpush3.bf16.msra.mxu1 %v3431_v44  ;;  %1468 = vmatprep.mubr.bf16.mxu0 %v3434_v46  ;;  %v3506_v46 = vld [vmem:[%s3854_s27 + $0x10] sm:$0xff]  }
  0x2d   : > { %2978 = vmatprep.subr.bf16.mxu1 %v3436_v48  ;;  %v3508_v48 = vld [vmem:[%s3854_s27 + $0x18] sm:$0xff]  }
  0x2e   : > { %3049 = vmatpush3.bf16.msra.mxu0 %v3430_v43  ;;  %v3513_v43 = vld [vmem:[%s4436_s8 + $0x8] sm:$0x1f]  }
  0x2f   : > { %3248 = vmatprep.subr.bf16.mxu0 %v3549_v1  ;;  %v1979_v44 = vand.u32 %v3513_v43, %v3634_v5 }
  0x30   : > { %2979 = vmatpush3.bf16.msra.mxu1 %v3437_v49  ;;  %v3509_v49 = vld [vmem:[%s3765_s22 + $0x88] ss:$20 sps:$4 sm:$0xff]  }
  0x31   : > { %1469 = vmatmul.mubr.bf16.vlgmr.msra.gmra.mrb[16].mxu0 %v3432_v45  ;;  %3196 = vmatprep.subr.bf16.mxu1 %v3549_v1  ;;  %v3505_v45 = vld [vmem:[%s3765_s22 + $0x38] ss:$20 sps:$4 sm:$0xff]  }
  0x32   : > { %3193 = vmatmul.mubr.msk.bf16.gmra.mrb[16].mxu1 %vm562_vm3, %v3435_v47  ;;  %1476 = vmatprep.mubr.bf16.mxu0 %v3441_v51  ;;  %v3507_v47 = vld [vmem:[%s3765_s22 + $0x60] ss:$20 sps:$4 sm:$0xff]   ;;  %v3531_v51 = vld [vmem:[%s4437_s9 + $0x8] sm:$0x1f]  }
  0x33   : > { %1363 = vmatprep.mubr.bf16.mxu1 %v3440_v50  ;;  %3249 = vmatpush3.bf16.msra.mxu0 %v3466_v63  ;;  %v3510_v50 = vld [vmem:[%s3854_s27 + $0x20] sm:$0xff]   ;;  %v3533_v63 = vld [vmem:[%s3889_s19 + $0x8] sm:$0xff]  }
  0x34   : > { %3250 = vmatprep.subr.bf16.mxu0 %v3549_v1 }
  0x37   : > { %3251 = vmatpush3.bf16.msra.mxu0 %v3481_v8 }
  0x38   : > { %3252 = vmatprep.subr.bf16.mxu0 %v3549_v1 }
  0x39   : > { %1477 = vmatmul.mubr.bf16.gmra.mrb[20].mxu0 %v3443_v53  ;;  %v3511_v53 = vld [vmem:[%s3765_s22 + $0xb0] ss:$20 sps:$4 sm:$0xff]  }
  0x3a   : > { %1364 = vmatmul.mubr.bf16.vlgmr.msra.gmra.mrb[20].mxu1 %v3438_v52  ;;  %1484 = vmatprep.mubr.bf16.mxu0 %v3447_v56  ;;  %v2192_v52 = vand.u32 %v3531_v51, %v3634_v5  ;;  %v3515_v56 = vld [vmem:[%s3854_s27 + $0x30] sm:$0xff]   ;;  %v3530_v51 = vld [vmem:[%s3878_s15 + $0x40] sm:$0xff]  }
  0x3b   : > { %3197 = vmatpush3.bf16.msra.mxu1 %v3444_v54  ;;  %1371 = vmatprep.mubr.bf16.mxu1 %v3445_v55  ;;  %v3512_v54 = vld [vmem:[%s3854_s27 + $0x28] sm:$0xff]   ;;  %v3516_v5 = vld [vmem:[%s3765_s22 + $0x100] ss:$20 sps:$4 sm:$0xff]  }
  0x3c   : > { %3198 = vmatprep.subr.bf16.mxu1 %v3549_v1  ;;  %3253 = vmatpush3.bf16.msra.mxu0 %v3495_v15  ;;  %v3514_v55 = vld [vmem:[%s3765_s22 + $0xd8] ss:$20 sps:$4 sm:$0xff]  }
  0x3d   : > { %3254 = vmatprep.subr.bf16.mxu0 %v3549_v1 }
  0x3f   : > { %3199 = vmatpush3.bf16.msra.mxu1 %v3451_v57  ;;  %v3517_v57 = vld [vmem:[%s3854_s27 + $0x38] sm:$0xff]  }
  0x40   : > { %3200 = vmatprep.subr.bf16.mxu1 %v3549_v1  ;;  %3255 = vmatpush3.bf16.msra.mxu0 %v1766_v23 }
  0x41   : > { %1485 = vmatmul.mubr.bf16.gmra.mrb[24].mxu0 %v3450_v59  ;;  %3332 = vmatprep.subr.bf16.mxu0 %v3549_v1  ;;  %v3519_v59 = vld [vmem:[%s3854_s27 + $0x40] sm:$0xff]   ;;  %s3554_s27 = smov 32  }
  0x42   : > { %1372 = vmatmul.mubr.bf16.gmra.mrb[24].mxu1 %v3449_v58  ;;  %1492 = vmatprep.mubr.bf16.mxu0 %v3454_v61  ;;  %v3518_v58 = vld [vmem:[%s3765_s22 + $0x128] ss:$20 sps:$4 sm:$0xff]   ;;  %v3532_v61 = vld [vmem:[%s3889_s19] sm:$0xff]  }
  0x43   : > { %1379 = vmatprep.mubr.bf16.mxu1 %v3452_v60  ;;  %3201 = vmatpush3.bf16.msra.mxu1 %v3458_v62  ;;  %v3520_v60 = vld [vmem:[%s3765_s22 + $0x150] ss:$20 sps:$4 sm:$0xff]   ;;  %s3553_s22 = smov 64  }
  0x44   : > { %3202 = vmatprep.subr.bf16.mxu1 %v3549_v1  ;;  %v3521_v62 = vld [vmem:[%s3878_s15] sm:$0xff]  }
  0x47   : > { %3203 = vmatpush3.bf16.msra.mxu1 %v3465_v0  ;;  %v3522_v0 = vld [vmem:[%s3878_s15 + $0x8] sm:$0xff]  }
  0x48   : > { %3204 = vmatprep.subr.bf16.mxu1 %v3549_v1 }
  0x49   : > { %1493 = vmatmul.mubr.bf16.gmra.mrb[28].mxu0 %v3457_v3  ;;  %v3523_v3 = vld [vmem:[%s3878_s15 + $0x10] sm:$0xff]  }
  0x4a   : > { %1380 = vmatmul.mubr.bf16.gmra.mrb[28].mxu1 %v3456_v2  ;;  %1500 = vmatprep.mubr.bf16.mxu0 %v3461_v6  ;;  %v3534_v2 = vld [vmem:[%s3889_s19 + $0x10] sm:$0xff]   ;;  %v3524_v6 = vld [vmem:[%s3878_s15 + $0x18] sm:$0xff]  }
  0x4b   : > { %1387 = vmatprep.mubr.bf16.mxu1 %v3459_v4  ;;  %3205 = vmatpush3.bf16.msra.mxu1 %v3473_v7  ;;  %v3535_v4 = vld [vmem:[%s3889_s19 + $0x18] sm:$0xff]   ;;  %v3536_v7 = vld [vmem:[%s3889_s19 + $0x20] sm:$0xff]  }
  0x4c   : > { %3206 = vmatprep.subr.bf16.mxu1 %v3549_v1 }
  0x4f   : > { %3207 = vmatpush3.bf16.msra.mxu1 %v3480_v9 }
  0x50   : > { %3208 = vmatprep.subr.bf16.mxu1 %v3549_v1 }
  0x51   : > { %1501 = vmatmul.mubr.bf16.gmra.mrb[32].mxu0 %v3464_v11 }
  0x52   : > { %1388 = vmatmul.mubr.bf16.gmra.mrb[32].mxu1 %v3463_v10  ;;  %1508 = vmatprep.mubr.bf16.mxu0 %v3469_v13 }
  0x53   : > { %1395 = vmatprep.mubr.bf16.mxu1 %v3467_v12  ;;  %3209 = vmatpush3.bf16.msra.mxu1 %v3488_v14  ;;  %v3525_v12 = vld [vmem:[%s3878_s15 + $0x20] sm:$0xff]   ;;  %v3537_v14 = vld [vmem:[%s3889_s19 + $0x28] sm:$0xff]  }
  0x54   : > { %3210 = vmatprep.subr.bf16.mxu1 %v3549_v1 }
  0x57   : > { %3211 = vmatpush3.bf16.msra.mxu1 %v1329_v22  ;;  %v3526_v22 = vld [vmem:[%s3878_s15 + $0x28] sm:$0xff]  }
  0x58   : > { %3292 = vmatprep.subr.bf16.mxu1 %v3549_v1 }
  0x59   : > { %1509 = vmatmul.mubr.bf16.gmra.mrb[36].mxu0 %v3472_v21 }
  0x5a   : > { %1396 = vmatmul.mubr.bf16.gmra.mrb[36].mxu1 %v3471_v20  ;;  %1516 = vmatprep.mubr.bf16.mxu0 %v3476_v25 }
  0x5b   : > { %1403 = vmatprep.mubr.bf16.mxu1 %v3474_v24  ;;  %v3538_v24 = vld [vmem:[%s3889_s19 + $0x30] sm:$0xff]  }
  0x61   : > { %1517 = vmatmul.mubr.bf16.gmra.mrb[40].mxu0 %v3479_v27 }
  0x62   : > { %1404 = vmatmul.mubr.bf16.gmra.mrb[40].mxu1 %v3478_v26  ;;  %1524 = vmatprep.mubr.bf16.mxu0 %v3484_v29 }
  0x63   : > { %1411 = vmatprep.mubr.bf16.mxu1 %v3482_v28 }
  0x69   : > { %1525 = vmatmul.mubr.bf16.gmra.mrb[44].mxu0 %v3487_v31 }
  0x6a   : > { %1412 = vmatmul.mubr.bf16.gmra.mrb[44].mxu1 %v3486_v30  ;;  %1532 = vmatprep.mubr.bf16.mxu0 %v3491_v33 }
  0x6b   : > { %1419 = vmatprep.mubr.bf16.mxu1 %v3489_v32  ;;  %v3528_v32 = vld [vmem:[%s3878_s15 + $0x30] sm:$0xff]  }
  0x71   : > { %1533 = vmatmul.mubr.bf16.gmra.mrb[48].mxu0 %v3494_v35 }
  0x72   : > { %1420 = vmatmul.mubr.bf16.gmra.mrb[48].mxu1 %v3493_v34  ;;  %3256 = vmatprep.mubr.msk.bf16.mxu0 %vm3551_vm2, %v3549_v1  ;;  %v3539_v34 = vld [vmem:[%s3889_s19 + $0x38] sm:$0xff]  }
  0x73   : > { %1427 = vmatprep.mubr.bf16.mxu1 %v3498_v36 }
  0x79   : > { %3257 = vmatmul.mubr.msk.bf16.vlgmr.msra.gmra.mrb[52].mxu0 %vm1737_vm5, %v3501_v38 }
  0x7a   : > { %1428 = vmatmul.mubr.bf16.gmra.mrb[52].mxu1 %v3500_v37  ;;  %3260 = vmatprep.mubr.msk.bf16.mxu0 %vm3551_vm2, %v3549_v1 }
  0x7b   : > { %3212 = vmatprep.mubr.msk.bf16.mxu1 %vm3551_vm2, %v3549_v1  ;;  %3333 = vmatpush3.bf16.msra.mxu0 %v3527_v39 }
  0x7c   : > { %3334 = vmatprep.subr.bf16.mxu0 %v3549_v1 }
  0x7f   : > { %3335 = vmatpush3.bf16.msra.mxu0 %v2192_v52 }
  0x81   : > { %3261 = vmatmul.mubr.msk.bf16.gmra.mrb[56].mxu0 %vm1737_vm5, %v3503_v41 }
  0x82   : > { %3213 = vmatmul.mubr.msk.bf16.vlgmr.msra.gmra.mrb[56].mxu1 %vm1297_vm6, %v3502_v40  ;;  %3264 = vmatprep.mubr.msk.bf16.mxu0 %vm3551_vm2, %v3549_v1 }
  0x83   : > { %3293 = vmatpush3.bf16.msra.mxu1 %v3504_v42  ;;  %3216 = vmatprep.mubr.msk.bf16.mxu1 %vm3551_vm2, %v3549_v1  ;;  %v3529_v42 = vld [vmem:[%s3878_s15 + $0x38] sm:$0xff]  }
  0x84   : > { %3294 = vmatprep.subr.bf16.mxu1 %v3549_v1 }
  0x87   : > { %3295 = vmatpush3.bf16.msra.mxu1 %v1979_v44  ;;  %v3540_v44 = vld [vmem:[%s3889_s19 + $0x40] sm:$0xff]  }
  0x89   : > { %3265 = vmatmul.mubr.msk.bf16.gmra.mrb[60].mxu0 %vm1737_vm5, %v3506_v46 }
  0x8a   : > { %3217 = vmatmul.mubr.msk.bf16.gmra.mrb[60].mxu1 %vm1297_vm6, %v3505_v45  ;;  %3268 = vmatprep.mubr.msk.bf16.mxu0 %vm3551_vm2, %v3549_v1 }
  0x8b   : > { %3220 = vmatprep.mubr.msk.bf16.mxu1 %vm3551_vm2, %v3549_v1 }
  0x91   : > { %3269 = vmatmul.mubr.msk.bf16.gmra.mrb[64].mxu0 %vm1737_vm5, %v3508_v48 }
  0x92   : > { %3221 = vmatmul.mubr.msk.bf16.gmra.mrb[64].mxu1 %vm1297_vm6, %v3507_v47  ;;  %3272 = vmatprep.mubr.msk.bf16.mxu0 %vm3551_vm2, %v3549_v1 }
  0x93   : > { %3224 = vmatprep.mubr.msk.bf16.mxu1 %vm3551_vm2, %v3549_v1 }
  0x99   : > { %3273 = vmatmul.mubr.msk.bf16.gmra.mrb[68].mxu0 %vm1737_vm5, %v3510_v50 }
  0x9a   : > { %3225 = vmatmul.mubr.msk.bf16.gmra.mrb[68].mxu1 %vm1297_vm6, %v3509_v49  ;;  %3276 = vmatprep.mubr.msk.bf16.mxu0 %vm3551_vm2, %v3549_v1 }
  0x9b   : > { %3228 = vmatprep.mubr.msk.bf16.mxu1 %vm3551_vm2, %v3549_v1 }
  0xa1   : > { %3277 = vmatmul.mubr.msk.bf16.gmra.mrb[72].mxu0 %vm1737_vm5, %v3512_v54 }
  0xa2   : > { %3229 = vmatmul.mubr.msk.bf16.gmra.mrb[72].mxu1 %vm1297_vm6, %v3511_v53  ;;  %3280 = vmatprep.mubr.msk.bf16.mxu0 %vm3551_vm2, %v3549_v1 }
  0xa3   : > { %3232 = vmatprep.mubr.msk.bf16.mxu1 %vm3551_vm2, %v3549_v1 }
  0xa9   : > { %3281 = vmatmul.mubr.msk.bf16.gmra.mrb[76].mxu0 %vm1737_vm5, %v3515_v56 }
  0xaa   : > { %3233 = vmatmul.mubr.msk.bf16.gmra.mrb[76].mxu1 %vm1297_vm6, %v3514_v55  ;;  %3284 = vmatprep.mubr.msk.bf16.mxu0 %vm3551_vm2, %v3549_v1 }
  0xab   : > { %3236 = vmatprep.mubr.msk.bf16.mxu1 %vm3551_vm2, %v3549_v1 }
  0xb1   : > { %3285 = vmatmul.mubr.msk.bf16.gmra.mrb[80].mxu0 %vm1737_vm5, %v3517_v57 }
  0xb2   : > { %3237 = vmatmul.mubr.msk.bf16.gmra.mrb[80].mxu1 %vm1297_vm6, %v3516_v5  ;;  %3288 = vmatprep.mubr.msk.bf16.mxu0 %vm3551_vm2, %v3549_v1 }
  0xb3   : > { %3240 = vmatprep.mubr.msk.bf16.mxu1 %vm3551_vm2, %v3549_v1 }
  0xb9   : > { %3289 = vmatmul.mubr.msk.bf16.gmra.mrb[84].mxu0 %vm1737_vm5, %v3519_v59 }
  0xba   : > { %3241 = vmatmul.mubr.msk.bf16.gmra.mrb[84].mxu1 %vm1297_vm6, %v3518_v58  ;;  %3336 = vmatprep.mubr.msk.bf16.mxu0 %vm3551_vm2, %v3549_v1 }
  0xbb   : > { %3244 = vmatprep.mubr.msk.bf16.mxu1 %vm3551_vm2, %v3549_v1 }
  0xc1   : > { %3337 = vmatmul.mubr.msk.bf16.vlgmr.msra.gmra.mrb[88].mxu0 %vm562_vm3, %v3532_v61 }
  0xc2   : > { %3245 = vmatmul.mubr.msk.bf16.gmra.mrb[88].mxu1 %vm1297_vm6, %v3520_v60  ;;  %3340 = vmatprep.mubr.msk.bf16.mxu0 %vm3551_vm2, %v3549_v1 }
  0xc3   : > { %3296 = vmatprep.mubr.msk.bf16.mxu1 %vm3551_vm2, %v3549_v1 }
  0xc9   : > { %3341 = vmatmul.mubr.msk.bf16.gmra.mrb[92].mxu0 %vm562_vm3, %v3533_v63 }
  0xca   : > { %3297 = vmatmul.mubr.msk.bf16.vlgmr.msra.gmra.mrb[92].mxu1 %vm562_vm3, %v3521_v62  ;;  %3344 = vmatprep.mubr.msk.bf16.mxu0 %vm3551_vm2, %v3549_v1 }
  0xcb   : > { %3300 = vmatprep.mubr.msk.bf16.mxu1 %vm3551_vm2, %v3549_v1 }
  0xd1   : > { %3345 = vmatmul.mubr.msk.bf16.gmra.mrb[96].mxu0 %vm562_vm3, %v3534_v2 }
  0xd2   : > { %3301 = vmatmul.mubr.msk.bf16.gmra.mrb[96].mxu1 %vm562_vm3, %v3522_v0  ;;  %3348 = vmatprep.mubr.msk.bf16.mxu0 %vm3551_vm2, %v3549_v1 }
  0xd3   : > { %3304 = vmatprep.mubr.msk.bf16.mxu1 %vm3551_vm2, %v3549_v1 }
  0xd9   : > { %3349 = vmatmul.mubr.msk.bf16.gmra.mrb[100].mxu0 %vm562_vm3, %v3535_v4 }
  0xda   : > { %3305 = vmatmul.mubr.msk.bf16.gmra.mrb[100].mxu1 %vm562_vm3, %v3523_v3  ;;  %3352 = vmatprep.mubr.msk.bf16.mxu0 %vm3551_vm2, %v3549_v1 }
  0xdb   : > { %3308 = vmatprep.mubr.msk.bf16.mxu1 %vm3551_vm2, %v3549_v1 }
  0xe1   : > { %3353 = vmatmul.mubr.msk.bf16.gmra.mrb[104].mxu0 %vm562_vm3, %v3536_v7 }
  0xe2   : > { %3309 = vmatmul.mubr.msk.bf16.gmra.mrb[104].mxu1 %vm562_vm3, %v3524_v6  ;;  %3356 = vmatprep.mubr.msk.bf16.mxu0 %vm3551_vm2, %v3549_v1 }
  0xe3   : > { %3312 = vmatprep.mubr.msk.bf16.mxu1 %vm3551_vm2, %v3549_v1 }
  0xe4   : > { %v4020_v8 = vpop.f32.mrb[0].mxu0 }
  0xe5   : > { %v4022_v9 = vpop.f32.mrb[0].mxu1  ;;  %v3162_v10 = vpop.f32.mrb[1].mxu0 }
  0xe6   : > { %v3178_v11 = vpop.f32.mrb[1].mxu1  ;;  %v4025_v13 = vpop.f32.mrb[2].mxu0 }
  0xe7   : > { %v4028_v15 = vpop.f32.mrb[2].mxu1  ;;  %v3163_v16 = vpop.f32.mrb[3].mxu0 }
  0xe8   : > { %v3179_v17 = vpop.f32.mrb[3].mxu1 }
  0xe9   : > { %3357 = vmatmul.mubr.msk.bf16.gmra.mrb[108].mxu0 %vm562_vm3, %v3537_v14 }
  0xea   : > { %3313 = vmatmul.mubr.msk.bf16.gmra.mrb[108].mxu1 %vm562_vm3, %v3525_v12  ;;  %3360 = vmatprep.mubr.msk.bf16.mxu0 %vm3551_vm2, %v3549_v1 }
  0xeb   : > { %3316 = vmatprep.mubr.msk.bf16.mxu1 %vm3551_vm2, %v3549_v1 }
  0xec   : > { %v4036_v18 = vpop.f32.mrb[4].mxu0 }
  0xed   : > { %v4038_v19 = vpop.f32.mrb[4].mxu1  ;;  %v3166_v20 = vpop.f32.mrb[5].mxu0 }
  0xee   : > { %v3182_v21 = vpop.f32.mrb[5].mxu1  ;;  %v4041_v23 = vpop.f32.mrb[6].mxu0 }
  0xef   : > { %v4044_v25 = vpop.f32.mrb[6].mxu1  ;;  %v3167_v26 = vpop.f32.mrb[7].mxu0 }
  0xf0   : > { %v3183_v27 = vpop.f32.mrb[7].mxu1 }
  0xf1   : > { %3361 = vmatmul.mubr.msk.bf16.gmra.mrb[112].mxu0 %vm562_vm3, %v3538_v24 }
  0xf2   : > { %3317 = vmatmul.mubr.msk.bf16.gmra.mrb[112].mxu1 %vm562_vm3, %v3526_v22  ;;  %3364 = vmatprep.mubr.msk.bf16.mxu0 %vm3551_vm2, %v3549_v1 }
  0xf3   : > { %3320 = vmatprep.mubr.msk.bf16.mxu1 %vm3551_vm2, %v3549_v1 }
  0xf4   : > { %v4052_v28 = vpop.f32.mrb[8].mxu0 }
  0xf5   : > { %v4054_v29 = vpop.f32.mrb[8].mxu1  ;;  %v3170_v30 = vpop.f32.mrb[9].mxu0 }
  0xf6   : > { %v3186_v31 = vpop.f32.mrb[9].mxu1  ;;  %v4057_v33 = vpop.f32.mrb[10].mxu0 }
  0xf7   : > { %v4060_v35 = vpop.f32.mrb[10].mxu1  ;;  %v3171_v36 = vpop.f32.mrb[11].mxu0 }
  0xf8   : > { %v3187_v37 = vpop.f32.mrb[11].mxu1 }
  0xf9   : > { %3365 = vmatmul.mubr.msk.bf16.gmra.mrb[116].mxu0 %vm562_vm3, %v3539_v34 }
  0xfa   : > { %3321 = vmatmul.mubr.msk.bf16.gmra.mrb[116].mxu1 %vm562_vm3, %v3528_v32  ;;  %3368 = vmatprep.mubr.msk.bf16.mxu0 %vm3551_vm2, %v3549_v1 }
  0xfb   : > { %3324 = vmatprep.mubr.msk.bf16.mxu1 %vm3551_vm2, %v3549_v1 }
  0xfc   : > { %v4068_v38 = vpop.f32.mrb[12].mxu0 }
  0xfd   : > { %v4070_v39 = vpop.f32.mrb[12].mxu1  ;;  %v3174_v40 = vpop.f32.mrb[13].mxu0 }
  0xfe   : > { %v3190_v41 = vpop.f32.mrb[13].mxu1  ;;  %v4073_v43 = vpop.f32.mrb[14].mxu0 }
  0xff   : > { %v4076_v45 = vpop.f32.mrb[14].mxu1  ;;  %v3175_v46 = vpop.f32.mrb[15].mxu0 }
 0x100   : > { %v3191_v47 = vpop.f32.mrb[15].mxu1 }
 0x101   : > { %3369 = vmatmul.mubr.msk.bf16.gmra.mrb[120].mxu0 %vm562_vm3, %v3540_v44 }
 0x102   : > { %3325 = vmatmul.mubr.msk.bf16.gmra.mrb[120].mxu1 %vm562_vm3, %v3529_v42 }
 0x103   : > { %3328 = vmatprep.mubr.msk.bf16.mxu1 %vm3551_vm2, %v3549_v1 }
 0x104   : > { %v3050_v49 = vpop.f32.mrb[16].mxu0 }
 0x105   : > { %v4082_v48 = vpop.f32.mrb[16].mxu1  ;;  %v3051_v52 = vpop.f32.mrb[17].mxu0 }
 0x106   : > { %v3194_v50 = vpop.f32.mrb[17].mxu1  ;;  %v3052_v54 = vadd.f32 %v3051_v52, %v3050_v49  ;;  %v3053_v55 = vpop.f32.mrb[18].mxu0 }
 0x107   : > { %v4085_v53 = vpop.f32.mrb[18].mxu1  ;;  %v3054_v5 = vpop.f32.mrb[19].mxu0 }
 0x108   : > { %v3195_v56 = vpop.f32.mrb[19].mxu1  ;;  %v3055_v57 = vadd.f32 %v3054_v5, %v3053_v55 }
 0x10a   : > { %3329 = vmatmul.mubr.msk.bf16.gmra.mrb[124].mxu1 %vm562_vm3, %v3530_v51 }
 0x10c   : > { %v3056_v59 = vpop.f32.mrb[20].mxu0 }
 0x10d   : > { %v2980_v58 = vpop.f32.mrb[20].mxu1  ;;  %v3057_v61 = vpop.f32.mrb[21].mxu0 }
 0x10e   : > { %v2981_v60 = vpop.f32.mrb[21].mxu1  ;;  %v3058_v63 = vadd.f32 %v3057_v61, %v3056_v59  ;;  %v3059_v0 = vpop.f32.mrb[22].mxu0 }
 0x10f   : > { %v2982_v1 = vadd.f32 %v2981_v60, %v2980_v58  ;;  %v2983_v62 = vpop.f32.mrb[22].mxu1  ;;  %v3060_v3 = vpop.f32.mrb[23].mxu0 }
 0x110   : > { %v2984_v2 = vpop.f32.mrb[23].mxu1  ;;  %v3061_v6 = vadd.f32 %v3060_v3, %v3059_v0 }
 0x111   : > { %v2985_v4 = vadd.f32 %v2984_v2, %v2983_v62  ;;  %v4088_v7 = vadd.f32 %v3052_v54, %v2982_v1 }
 0x113   : > { %v4090_v10 = vadd.f32 %v3055_v57, %v2985_v4 }
 0x114   : > { %v3062_v12 = vpop.f32.mrb[24].mxu0 }
 0x115   : > { %v2986_v11 = vpop.f32.mrb[24].mxu1  ;;  %v3063_v16 = vpop.f32.mrb[25].mxu0 }
 0x116   : > { %v2987_v14 = vpop.f32.mrb[25].mxu1  ;;  %v3064_v21 = vadd.f32 %v3063_v16, %v3062_v12  ;;  %v3065_v22 = vpop.f32.mrb[26].mxu0 }
 0x117   : > { %v2988_v17 = vadd.f32 %v2987_v14, %v2986_v11  ;;  %v2989_v20 = vpop.f32.mrb[26].mxu1  ;;  %v3066_v26 = vpop.f32.mrb[27].mxu0 }
 0x118   : > { %v2990_v24 = vpop.f32.mrb[27].mxu1  ;;  %v3067_v30 = vadd.f32 %v3066_v26, %v3065_v22 }
 0x119   : > { %v2991_v27 = vadd.f32 %v2990_v24, %v2989_v20  ;;  %v4092_v31 = vadd.f32 %v3058_v63, %v2988_v17 }
 0x11b   : > { %v4094_v32 = vadd.f32 %v3061_v6, %v2991_v27 }
 0x11c   : > { %v3068_v36 = vpop.f32.mrb[28].mxu0 }
 0x11d   : > { %v2992_v34 = vpop.f32.mrb[28].mxu1  ;;  %v3069_v40 = vpop.f32.mrb[29].mxu0 }
 0x11e   : > { %v2993_v37 = vpop.f32.mrb[29].mxu1  ;;  %v3070_v44 = vadd.f32 %v3069_v40, %v3068_v36  ;;  %v3071_v46 = vpop.f32.mrb[30].mxu0 }
 0x11f   : > { %v2994_v41 = vadd.f32 %v2993_v37, %v2992_v34  ;;  %v2995_v42 = vpop.f32.mrb[30].mxu1  ;;  %v3072_v49 = vpop.f32.mrb[31].mxu0 }
 0x120   : > { %v2996_v47 = vpop.f32.mrb[31].mxu1  ;;  %v3073_v51 = vadd.f32 %v3072_v49, %v3071_v46 }
 0x121   : > { %v2997_v50 = vadd.f32 %v2996_v47, %v2995_v42  ;;  %v4096_v52 = vadd.f32 %v3064_v21, %v2994_v41 }
 0x123   : > { %v4098_v54 = vadd.f32 %v3067_v30, %v2997_v50 }
 0x124   : > { %v3074_v56 = vpop.f32.mrb[32].mxu0 }
 0x125   : > { %v2998_v55 = vpop.f32.mrb[32].mxu1  ;;  %v3075_v57 = vpop.f32.mrb[33].mxu0 }
 0x126   : > { %v2999_v5 = vpop.f32.mrb[33].mxu1  ;;  %v3076_v60 = vadd.f32 %v3075_v57, %v3074_v56  ;;  %v3077_v61 = vpop.f32.mrb[34].mxu0 }
 0x127   : > { %v3000_v58 = vadd.f32 %v2999_v5, %v2998_v55  ;;  %v3001_v59 = vpop.f32.mrb[34].mxu1  ;;  %v3078_v62 = vpop.f32.mrb[35].mxu0 }
 0x128   : > { %v3002_v1 = vpop.f32.mrb[35].mxu1  ;;  %v3079_v0 = vadd.f32 %v3078_v62, %v3077_v61 }
 0x129   : > { %v3003_v63 = vadd.f32 %v3002_v1, %v3001_v59  ;;  %v4100_v2 = vadd.f32 %v3070_v44, %v3000_v58 }
 0x12b   : > { %v4102_v3 = vadd.f32 %v3073_v51, %v3003_v63 }
 0x12c   : > { %v3080_v6 = vpop.f32.mrb[36].mxu0 }
 0x12d   : > { %v3004_v4 = vpop.f32.mrb[36].mxu1  ;;  %v3081_v12 = vpop.f32.mrb[37].mxu0 }
 0x12e   : > { %v3005_v11 = vpop.f32.mrb[37].mxu1  ;;  %v3082_v17 = vadd.f32 %v3081_v12, %v3080_v6  ;;  %v3083_v20 = vpop.f32.mrb[38].mxu0 }
 0x12f   : > { %v3006_v14 = vadd.f32 %v3005_v11, %v3004_v4  ;;  %v3007_v16 = vpop.f32.mrb[38].mxu1  ;;  %v3084_v22 = vpop.f32.mrb[39].mxu0 }
 0x130   : > { %v3008_v21 = vpop.f32.mrb[39].mxu1  ;;  %v3085_v26 = vadd.f32 %v3084_v22, %v3083_v20 }
 0x131   : > { %v3009_v24 = vadd.f32 %v3008_v21, %v3007_v16  ;;  %v4104_v27 = vadd.f32 %v3076_v60, %v3006_v14 }
 0x133   : > { %v4106_v30 = vadd.f32 %v3079_v0, %v3009_v24 }
 0x134   : > { %v3086_v36 = vpop.f32.mrb[40].mxu0 }
 0x135   : > { %v3010_v34 = vpop.f32.mrb[40].mxu1  ;;  %v3087_v40 = vpop.f32.mrb[41].mxu0 }
 0x136   : > { %v3011_v37 = vpop.f32.mrb[41].mxu1  ;;  %v3088_v44 = vadd.f32 %v3087_v40, %v3086_v36  ;;  %v3089_v46 = vpop.f32.mrb[42].mxu0 }
 0x137   : > { %v3012_v41 = vadd.f32 %v3011_v37, %v3010_v34  ;;  %v3013_v42 = vpop.f32.mrb[42].mxu1  ;;  %v3090_v49 = vpop.f32.mrb[43].mxu0 }
 0x138   : > { %v3014_v47 = vpop.f32.mrb[43].mxu1  ;;  %v3091_v51 = vadd.f32 %v3090_v49, %v3089_v46 }
 0x139   : > { %v3015_v50 = vadd.f32 %v3014_v47, %v3013_v42  ;;  %v4108_v55 = vadd.f32 %v3082_v17, %v3012_v41 }
 0x13b   : > { %v4110_v56 = vadd.f32 %v3085_v26, %v3015_v50 }
 0x13c   : > { %v3092_v57 = vpop.f32.mrb[44].mxu0 }
 0x13d   : > { %v3016_v5 = vpop.f32.mrb[44].mxu1  ;;  %v3093_v59 = vpop.f32.mrb[45].mxu0 }
 0x13e   : > { %v3017_v58 = vpop.f32.mrb[45].mxu1  ;;  %v3094_v1 = vadd.f32 %v3093_v59, %v3092_v57  ;;  %v3095_v62 = vpop.f32.mrb[46].mxu0 }
 0x13f   : > { %v3018_v60 = vadd.f32 %v3017_v58, %v3016_v5  ;;  %v3019_v61 = vpop.f32.mrb[46].mxu1  ;;  %v3096_v0 = vpop.f32.mrb[47].mxu0 }
 0x140   : > { %v3020_v63 = vpop.f32.mrb[47].mxu1  ;;  %v3097_v6 = vadd.f32 %v3096_v0, %v3095_v62 }
 0x141   : > { %v3021_v4 = vadd.f32 %v3020_v63, %v3019_v61  ;;  %v4112_v11 = vadd.f32 %v3088_v44, %v3018_v60 }
 0x143   : > { %v4114_v12 = vadd.f32 %v3091_v51, %v3021_v4 }
 0x144   : > { %v3098_v16 = vpop.f32.mrb[48].mxu0 }
 0x145   : > { %v3022_v14 = vpop.f32.mrb[48].mxu1  ;;  %v3099_v20 = vpop.f32.mrb[49].mxu0 }
 0x146   : > { %v3023_v17 = vpop.f32.mrb[49].mxu1  ;;  %v3100_v24 = vadd.f32 %v3099_v20, %v3098_v16  ;;  %v3101_v26 = vpop.f32.mrb[50].mxu0 }
 0x147   : > { %v3024_v21 = vadd.f32 %v3023_v17, %v3022_v14  ;;  %v3025_v22 = vpop.f32.mrb[50].mxu1  ;;  %v3102_v36 = vpop.f32.mrb[51].mxu0 }
 0x148   : > { %v3026_v34 = vpop.f32.mrb[51].mxu1  ;;  %v3103_v40 = vadd.f32 %v3102_v36, %v3101_v26 }
 0x149   : > { %v3027_v37 = vadd.f32 %v3026_v34, %v3025_v22  ;;  %v4116_v41 = vadd.f32 %v3094_v1, %v3024_v21 }
 0x14b   : > { %v4118_v42 = vadd.f32 %v3097_v6, %v3027_v37 }
 0x14c   : > { %v1802_v46 = vpop.f32.mrb[52].mxu0 }
 0x14d   : > { %v3028_v44 = vpop.f32.mrb[52].mxu1  ;;  %2389 = vrot.lane.b32.xlu0 %v1802_v46, %s3553_s22  ;;  %v3258_v49 = vpop.f32.mrb[53].mxu0 }
 0x14e   : > { %v3029_v47 = vpop.f32.mrb[53].mxu1  ;;  %v1805_v5 = vpop.f32.mrb[54].mxu0 }
 0x14f   : > { %v3030_v50 = vadd.f32 %v3029_v47, %v3028_v44  ;;  %v3031_v51 = vpop.f32.mrb[54].mxu1  ;;  %v3259_v58 = vpop.f32.mrb[55].mxu0  ;;  %2391 = vrot.lane.b32.xlu1 %v1805_v5, %s3553_s22 }
 0x150   : > { %v3032_v57 = vpop.f32.mrb[55].mxu1 }
 0x151   : > { %v3033_v59 = vadd.f32 %v3032_v57, %v3031_v51  ;;  %v4122_v60 = vadd.f32 %v3100_v24, %v3030_v50 }
 0x153   : > { %v4124_v61 = vadd.f32 %v3103_v40, %v3033_v59 }
 0x154   : > { %v1810_v62 = vpop.f32.mrb[56].mxu0 }
 0x155   : > { %v1575_v1 = vpop.f32.mrb[56].mxu1  ;;  %2393 = vrot.lane.b32.xlu0 %v1810_v62, %s3553_s22  ;;  %v3262_v4 = vpop.f32.mrb[57].mxu0 }
 0x156   : > { %v1576_v63 = vadd.f32 %v1575_v1, %v4088_v7  ;;  %v3214_v0 = vpop.f32.mrb[57].mxu1  ;;  %v1813_v14 = vpop.f32.mrb[58].mxu0 }
 0x157   : > { %v1578_v6 = vpop.f32.mrb[58].mxu1  ;;  %2395 = vrot.lane.b32.xlu1 %v1813_v14, %s3553_s22  ;;  %v3263_v20 = vpop.f32.mrb[59].mxu0 }
 0x158   : > { %v1579_v16 = vadd.f32 %v1578_v6, %v4090_v10  ;;  %v3215_v17 = vpop.f32.mrb[59].mxu1 }
 0x159   : > { %2317 = vrot.lane.b32.xlu0 %v1576_v63, %s3554_s27 }
 0x15c   : > { %v1818_v22 = vpop.f32.mrb[60].mxu0 }
 0x15d   : > { %v1583_v21 = vpop.f32.mrb[60].mxu1  ;;  %2319 = vrot.lane.b32.xlu0 %v1579_v16, %s3554_s27  ;;  %v3266_v26 = vpop.f32.mrb[61].mxu0 }
 0x15e   : > { %v1584_v24 = vadd.f32 %v1583_v21, %v4092_v31  ;;  %v3218_v7 = vpop.f32.mrb[61].mxu1  ;;  %v1821_v36 = vpop.f32.mrb[62].mxu0 }
 0x15f   : > { %v1586_v34 = vpop.f32.mrb[62].mxu1  ;;  %v3267_v40 = vpop.f32.mrb[63].mxu0 }
 0x160   : > { %v1587_v37 = vadd.f32 %v1586_v34, %v4094_v32  ;;  %v3219_v10 = vpop.f32.mrb[63].mxu1  ;;  %2321 = vrot.lane.b32.xlu1 %v1584_v24, %s3554_s27 }
 0x161   : > { %2397 = vrot.lane.b32.xlu0 %v1818_v22, %s3553_s22 }
 0x164   : > { %2399 = vrot.lane.b32.xlu1 %v1821_v36, %s3553_s22  ;;  %v1826_v46 = vpop.f32.mrb[64].mxu0 }
 0x165   : > { %v1591_v44 = vpop.f32.mrb[64].mxu1  ;;  %2401 = vrot.lane.b32.xlu0 %v1826_v46, %s3553_s22  ;;  %v3270_v49 = vpop.f32.mrb[65].mxu0 }
 0x166   : > { %v1592_v31 = vadd.f32 %v1591_v44, %v4096_v52  ;;  %v3222_v47 = vpop.f32.mrb[65].mxu1  ;;  %v1829_v51 = vpop.f32.mrb[66].mxu0 }
 0x167   : > { %v1594_v50 = vpop.f32.mrb[66].mxu1  ;;  %v3271_v57 = vpop.f32.mrb[67].mxu0 }
 0x168   : > { %v1595_v32 = vadd.f32 %v1594_v50, %v4098_v54  ;;  %v3223_v5 = vpop.f32.mrb[67].mxu1  ;;  %2323 = vrot.lane.b32.xlu1 %v1587_v37, %s3554_s27 }
 0x169   : > { %2325 = vrot.lane.b32.xlu0 %v1592_v31, %s3554_s27 }
 0x16c   : > { %2403 = vrot.lane.b32.xlu1 %v1829_v51, %s3553_s22  ;;  %v1834_v59 = vpop.f32.mrb[68].mxu0 }
 0x16d   : > { %v1599_v58 = vpop.f32.mrb[68].mxu1  ;;  %2405 = vrot.lane.b32.xlu0 %v1834_v59, %s3553_s22  ;;  %v3274_v62 = vpop.f32.mrb[69].mxu0 }
 0x16e   : > { %v1600_v52 = vadd.f32 %v1599_v58, %v4100_v2  ;;  %v3226_v1 = vpop.f32.mrb[69].mxu1  ;;  %v1837_v0 = vpop.f32.mrb[70].mxu0  ;;  %v2574_v58 = vlaneseq }
 0x16f   : > { %v1602_v63 = vpop.f32.mrb[70].mxu1  ;;  %v3275_v6 = vpop.f32.mrb[71].mxu0  ;;  %v2572_v1 = vld [vmem:[%s4438_s10] sm:$0x3] }
 0x170   : > { %v1603_v54 = vadd.f32 %v1602_v63, %v4102_v3  ;;  %v3227_v4 = vpop.f32.mrb[71].mxu1  ;;  %2327 = vrot.lane.b32.xlu1 %v1595_v32, %s3554_s27  ;;  %v2575_v59 = vshrl.u32 %v2574_v58, 7 }
 0x171   : > { %2329 = vrot.lane.b32.xlu0 %v1600_v52, %s3554_s27 }
 0x174   : > { %2407 = vrot.lane.b32.xlu1 %v1837_v0, %s3553_s22  ;;  %v1842_v16 = vpop.f32.mrb[72].mxu0  ;;  %v2580_v0 = vsub.s32 1, %v2575_v59 }
 0x175   : > { %v1607_v14 = vpop.f32.mrb[72].mxu1  ;;  %2409 = vrot.lane.b32.xlu0 %v1842_v16, %s3553_s22  ;;  %v3278_v20 = vpop.f32.mrb[73].mxu0 }
 0x176   : > { %v1608_v2 = vadd.f32 %v1607_v14, %v4104_v27  ;;  %v3230_v17 = vpop.f32.mrb[73].mxu1  ;;  %v1845_v22 = vpop.f32.mrb[74].mxu0 }
 0x177   : > { %v1610_v21 = vpop.f32.mrb[74].mxu1  ;;  %v3279_v7 = vpop.f32.mrb[75].mxu0 }
 0x178   : > { %v1611_v3 = vadd.f32 %v1610_v21, %v4106_v30  ;;  %v3231_v24 = vpop.f32.mrb[75].mxu1  ;;  %2331 = vrot.lane.b32.xlu1 %v1603_v54, %s3554_s27  ;;  %v2576_v54 = vsub.s32 0, %v2575_v59 }
 0x179   : > { %2333 = vrot.lane.b32.xlu0 %v1608_v2, %s3554_s27 }
 0x17a   : > { %v4174_v17 = vrot.slane %v2572_v1, %v2576_v54 }
 0x17c   : > { %2411 = vrot.lane.b32.xlu1 %v1845_v22, %s3553_s22  ;;  %v1850_v34 = vpop.f32.mrb[76].mxu0 }
 0x17d   : > { %v1615_v26 = vpop.f32.mrb[76].mxu1  ;;  %2413 = vrot.lane.b32.xlu0 %v1850_v34, %s3553_s22  ;;  %v3282_v37 = vpop.f32.mrb[77].mxu0 }
 0x17e   : > { %v1616_v27 = vadd.f32 %v1615_v26, %v4108_v55  ;;  %v3234_v36 = vpop.f32.mrb[77].mxu1  ;;  %v1853_v40 = vpop.f32.mrb[78].mxu0 }
 0x17f   : > { %v1618_v10 = vpop.f32.mrb[78].mxu1  ;;  %v3283_v46 = vpop.f32.mrb[79].mxu0 }
 0x180   : > { %v1619_v30 = vadd.f32 %v1618_v10, %v4110_v56  ;;  %v3235_v44 = vpop.f32.mrb[79].mxu1  ;;  %2335 = vrot.lane.b32.xlu1 %v1611_v3, %s3554_s27 }
 0x181   : > { %2337 = vrot.lane.b32.xlu0 %v1616_v27, %s3554_s27 }
 0x184   : > { %2415 = vrot.lane.b32.xlu1 %v1853_v40, %s3553_s22  ;;  %v1858_v47 = vpop.f32.mrb[80].mxu0 }
 0x185   : > { %v1623_v31 = vpop.f32.mrb[80].mxu1  ;;  %2417 = vrot.lane.b32.xlu0 %v1858_v47, %s3553_s22  ;;  %v3286_v50 = vpop.f32.mrb[81].mxu0 }
 0x186   : > { %v1624_v55 = vadd.f32 %v1623_v31, %v4112_v11  ;;  %v3238_v49 = vpop.f32.mrb[81].mxu1  ;;  %v1861_v32 = vpop.f32.mrb[82].mxu0 }
 0x187   : > { %v1626_v51 = vpop.f32.mrb[82].mxu1  ;;  %v3287_v57 = vpop.f32.mrb[83].mxu0 }
 0x188   : > { %v1627_v56 = vadd.f32 %v1626_v51, %v4114_v12  ;;  %v3239_v5 = vpop.f32.mrb[83].mxu1  ;;  %2339 = vrot.lane.b32.xlu1 %v1619_v30, %s3554_s27 }
 0x189   : > { %2341 = vrot.lane.b32.xlu0 %v1624_v55, %s3554_s27 }
 0x18c   : > { %2419 = vrot.lane.b32.xlu1 %v1861_v32, %s3553_s22  ;;  %v1866_v11 = vpop.f32.mrb[84].mxu0 }
 0x18d   : > { %v1631_v52 = vpop.f32.mrb[84].mxu1  ;;  %2421 = vrot.lane.b32.xlu0 %v1866_v11, %s3553_s22  ;;  %v3290_v63 = vpop.f32.mrb[85].mxu0 }
 0x18e   : > { %v1632_v62 = vadd.f32 %v1631_v52, %v4116_v41  ;;  %v3242_v12 = vpop.f32.mrb[85].mxu1  ;;  %v1869_v6 = vpop.f32.mrb[86].mxu0  ;;  %v4178_v41 = vrot.slane %v2572_v1, %v2580_v0 }
 0x18f   : > { %v1634_v4 = vpop.f32.mrb[86].mxu1  ;;  %v3291_v2 = vpop.f32.mrb[87].mxu0 }
 0x190   : > { %v1635_v14 = vadd.f32 %v1634_v4, %v4118_v42  ;;  %v3243_v16 = vpop.f32.mrb[87].mxu1  ;;  %2343 = vrot.lane.b32.xlu1 %v1627_v56, %s3554_s27 }
 0x191   : > { %2345 = vrot.lane.b32.xlu0 %v1632_v62, %s3554_s27 }
 0x194   : > { %2423 = vrot.lane.b32.xlu1 %v1869_v6, %s3553_s22  ;;  %v2228_v20 = vpop.f32.mrb[88].mxu0 }
 0x195   : > { %v1639_v42 = vpop.f32.mrb[88].mxu1  ;;  %v2585_v3 = vadd.f32 %v4178_v41, %v2228_v20  ;;  %v3338_v24 = vpop.f32.mrb[89].mxu0 }
 0x196   : > { %v1640_v21 = vadd.f32 %v1639_v42, %v4122_v60  ;;  %v3246_v22 = vpop.f32.mrb[89].mxu1  ;;  %v2231_v26 = vpop.f32.mrb[90].mxu0 }
 0x197   : > { %v1642_v7 = vpop.f32.mrb[90].mxu1  ;;  %2621 = vst.msk [vmem:[%s4184_s18 + $0x8] sm:$0xff] %vm2515_vm7, %v2585_v3  ;;  %v2587_v36 = vadd.f32 %v4178_v41, %v2231_v26  ;;  %v3339_v60 = vpop.f32.mrb[91].mxu0 }
 0x198   : > { %v1643_v34 = vadd.f32 %v1642_v7, %v4124_v61  ;;  %v3247_v27 = vpop.f32.mrb[91].mxu1  ;;  %2347 = vrot.lane.b32.xlu1 %v1635_v14, %s3554_s27  ;;  %2349 = vrot.lane.b32.xlu0 %v1640_v21, %s3554_s27 }
 0x199   : > { %2623 = vst.msk [vmem:[%s4184_s18 + $0x18] sm:$0xff] %vm2515_vm7, %v2587_v36 }
 0x19c   : > { %2351 = vrot.lane.b32.xlu1 %v1643_v34, %s3554_s27  ;;  %v2236_v10 = vpop.f32.mrb[92].mxu0 }
 0x19d   : > { %v2015_v37 = vpop.f32.mrb[92].mxu1  ;;  %v2589_v61 = vadd.f32 %v4178_v41, %v2236_v10  ;;  %v3342_v30 = vpop.f32.mrb[93].mxu0 }
 0x19e   : > { %v3298_v40 = vpop.f32.mrb[93].mxu1  ;;  %2461 = vrot.lane.b32.xlu0 %v2015_v37, %s3555_s23  ;;  %v2239_v46 = vpop.f32.mrb[94].mxu0 }
 0x19f   : > { %v2018_v44 = vpop.f32.mrb[94].mxu1  ;;  %2625 = vst.msk [vmem:[%s4184_s18 + $0x28] sm:$0xff] %vm2515_vm7, %v2589_v61  ;;  %v2591_v47 = vadd.f32 %v4178_v41, %v2239_v46  ;;  %v3343_v55 = vpop.f32.mrb[95].mxu0 }
 0x1a0   : > { %v3299_v31 = vpop.f32.mrb[95].mxu1  ;;  %2463 = vrot.lane.b32.xlu1 %v2018_v44, %s3555_s23 }
 0x1a1   : > { %2627 = vst.msk [vmem:[%s4184_s18 + $0x38] sm:$0xff] %vm2515_vm7, %v2591_v47 }
 0x1a4   : > { %v2244_v50 = vpop.f32.mrb[96].mxu0 }
 0x1a5   : > { %v2023_v49 = vpop.f32.mrb[96].mxu1  ;;  %v2593_v32 = vadd.f32 %v4178_v41, %v2244_v50  ;;  %v3346_v56 = vpop.f32.mrb[97].mxu0 }
 0x1a6   : > { %v3302_v51 = vpop.f32.mrb[97].mxu1  ;;  %2465 = vrot.lane.b32.xlu0 %v2023_v49, %s3555_s23  ;;  %v2247_v57 = vpop.f32.mrb[98].mxu0 }
 0x1a7   : > { %v2026_v5 = vpop.f32.mrb[98].mxu1  ;;  %2629 = vst.msk [vmem:[%s4184_s18 + $0x48] sm:$0xff] %vm2515_vm7, %v2593_v32  ;;  %v2595_v59 = vadd.f32 %v4178_v41, %v2247_v57  ;;  %v3347_v52 = vpop.f32.mrb[99].mxu0 }
 0x1a8   : > { %v3303_v58 = vpop.f32.mrb[99].mxu1  ;;  %2467 = vrot.lane.b32.xlu1 %v2026_v5, %s3555_s23 }
 0x1a9   : > { %2631 = vst.msk [vmem:[%s4184_s18 + $0x58] sm:$0xff] %vm2515_vm7, %v2595_v59 }
 0x1ac   : > { %v2252_v1 = vpop.f32.mrb[100].mxu0 }
 0x1ad   : > { %v2031_v11 = vpop.f32.mrb[100].mxu1  ;;  %v2597_v12 = vadd.f32 %v4178_v41, %v2252_v1  ;;  %v3350_v63 = vpop.f32.mrb[101].mxu0 }
 0x1ae   : > { %v3306_v62 = vpop.f32.mrb[101].mxu1  ;;  %2469 = vrot.lane.b32.xlu0 %v2031_v11, %s3555_s23  ;;  %v2255_v54 = vpop.f32.mrb[102].mxu0 }
 0x1af   : > { %v2034_v0 = vpop.f32.mrb[102].mxu1  ;;  %2633 = vst.msk [vmem:[%s4184_s18 + $0x68] sm:$0xff] %vm2515_vm7, %v2597_v12  ;;  %v2599_v6 = vadd.f32 %v4178_v41, %v2255_v54  ;;  %v3351_v14 = vpop.f32.mrb[103].mxu0 }
 0x1b0   : > { %v3307_v4 = vpop.f32.mrb[103].mxu1  ;;  %2471 = vrot.lane.b32.xlu1 %v2034_v0, %s3555_s23 }
 0x1b1   : > { %2635 = vst.msk [vmem:[%s4184_s18 + $0x78] sm:$0xff] %vm2515_vm7, %v2599_v6 }
 0x1b4   : > { %v2260_v2 = vpop.f32.mrb[104].mxu0 }
 0x1b5   : > { %v2039_v16 = vpop.f32.mrb[104].mxu1  ;;  %v2601_v20 = vadd.f32 %v4178_v41, %v2260_v2  ;;  %v3354_v21 = vpop.f32.mrb[105].mxu0 }
 0x1b6   : > { %v3310_v42 = vpop.f32.mrb[105].mxu1  ;;  %2473 = vrot.lane.b32.xlu0 %v2039_v16, %s3555_s23  ;;  %v2263_v3 = vpop.f32.mrb[106].mxu0 }
 0x1b7   : > { %v2042_v22 = vpop.f32.mrb[106].mxu1  ;;  %2637 = vst.msk [vmem:[%s4184_s18 + $0x88] sm:$0xff] %vm2515_vm7, %v2601_v20  ;;  %v2603_v7 = vadd.f32 %v4178_v41, %v2263_v3  ;;  %v3355_v26 = vpop.f32.mrb[107].mxu0 }
 0x1b8   : > { %v3311_v24 = vpop.f32.mrb[107].mxu1  ;;  %2475 = vrot.lane.b32.xlu1 %v2042_v22, %s3555_s23 }
 0x1b9   : > { %2639 = vst.msk [vmem:[%s4184_s18 + $0x98] sm:$0xff] %vm2515_vm7, %v2603_v7 }
 0x1bc   : > { %v2268_v27 = vpop.f32.mrb[108].mxu0 }
 0x1bd   : > { %v2047_v34 = vpop.f32.mrb[108].mxu1  ;;  %v2605_v60 = vadd.f32 %v4178_v41, %v2268_v27  ;;  %v3358_v37 = vpop.f32.mrb[109].mxu0 }
 0x1be   : > { %v3314_v36 = vpop.f32.mrb[109].mxu1  ;;  %2477 = vrot.lane.b32.xlu0 %v2047_v34, %s3555_s23  ;;  %v2271_v40 = vpop.f32.mrb[110].mxu0 }
 0x1bf   : > { %v2050_v10 = vpop.f32.mrb[110].mxu1  ;;  %2641 = vst.msk [vmem:[%s4184_s18 + $0xa8] sm:$0xff] %vm2515_vm7, %v2605_v60  ;;  %v2607_v30 = vadd.f32 %v4178_v41, %v2271_v40  ;;  %v3359_v44 = vpop.f32.mrb[111].mxu0 }
 0x1c0   : > { %v3315_v61 = vpop.f32.mrb[111].mxu1  ;;  %2479 = vrot.lane.b32.xlu1 %v2050_v10, %s3555_s23  ;;  %v2390_v46 = vpop.permute.xlu0 %2389 }
 0x1c1   : > { %2643 = vst.msk [vmem:[%s4184_s18 + $0xb8] sm:$0xff] %vm2515_vm7, %v2607_v30  ;;  %v2392_v31 = vpop.permute.xlu1 %2391 }
 0x1c4   : > { %v2276_v55 = vpop.f32.mrb[112].mxu0 }
 0x1c5   : > { %v2055_v47 = vpop.f32.mrb[112].mxu1  ;;  %v2609_v50 = vadd.f32 %v4178_v41, %v2276_v55  ;;  %v3362_v51 = vpop.f32.mrb[113].mxu0 }
 0x1c6   : > { %v3318_v49 = vpop.f32.mrb[113].mxu1  ;;  %2481 = vrot.lane.b32.xlu0 %v2055_v47, %s3555_s23  ;;  %v2279_v56 = vpop.f32.mrb[114].mxu0 }
 0x1c7   : > { %v2058_v32 = vpop.f32.mrb[114].mxu1  ;;  %v2394_v57 = vpop.permute.xlu0 %2393  ;;  %2645 = vst.msk [vmem:[%s4184_s18 + $0xc8] sm:$0xff] %vm2515_vm7, %v2609_v50  ;;  %v2611_v58 = vadd.f32 %v4178_v41, %v2279_v56 }
 0x1c8   : > { %v3319_v5 = vpop.f32.mrb[115].mxu1  ;;  %2483 = vrot.lane.b32.xlu1 %v2058_v32, %s3555_s23  ;;  %v3363_v59 = vpop.f32.mrb[115].mxu0 }
 0x1c9   : > { %2647 = vst.msk [vmem:[%s4184_s18 + $0xd8] sm:$0xff] %vm2515_vm7, %v2611_v58  ;;  %v2396_v11 = vpop.permute.xlu1 %2395 }
 0x1cb   : > { %v2318_v52 = vpop.permute.xlu0 %2317 }
 0x1cc   : > { %v2516_v1 = vsel %vm2515_vm7, %v4020_v8, %v2318_v52  ;;  %v2284_v12 = vpop.f32.mrb[116].mxu0 }
 0x1cd   : > { %v2063_v62 = vpop.f32.mrb[116].mxu1  ;;  %v4249_v0 = vsel %vm2534_vm8, %v2516_v1, %v2390_v46  ;;  %v2613_v54 = vadd.f32 %v4178_v41, %v2284_v12  ;;  %v3366_v4 = vpop.f32.mrb[117].mxu0 }
 0x1ce   : > { %v3322_v63 = vpop.f32.mrb[117].mxu1  ;;  %2485 = vrot.lane.b32.xlu0 %v2063_v62, %s3555_s23  ;;  %v2287_v14 = vpop.f32.mrb[118].mxu0 }
 0x1cf   : > { %v2066_v6 = vpop.f32.mrb[118].mxu1  ;;  %v2320_v2 = vpop.permute.xlu0 %2319  ;;  %2649 = vst.msk [vmem:[%s4184_s18 + $0xe8] sm:$0xff] %vm2515_vm7, %v2613_v54  ;;  %v2615_v8 = vadd.f32 %v4178_v41, %v2287_v14 }
 0x1d0   : > { %v3323_v16 = vpop.f32.mrb[119].mxu1  ;;  %2487 = vrot.lane.b32.xlu1 %v2066_v6, %s3555_s23  ;;  %v2517_v42 = vsel %vm2515_vm7, %v4025_v13, %v2320_v2  ;;  %v3367_v20 = vpop.f32.mrb[119].mxu0 }
 0x1d1   : > { %v4259_v22 = vsel %vm2534_vm8, %v2517_v42, %v2392_v31  ;;  %2651 = vst.msk [vmem:[%s4184_s18 + $0xf8] sm:$0xff] %vm2515_vm7, %v2615_v8 }
 0x1d2   : > { %v2322_v21 = vpop.permute.xlu1 %2321 }
 0x1d3   : > { %v2518_v3 = vsel %vm2515_vm7, %v4036_v18, %v2322_v21  ;;  %v2398_v24 = vpop.permute.xlu0 %2397 }
 0x1d4   : > { %v4266_v7 = vsel %vm2534_vm8, %v2518_v3, %v2394_v57  ;;  %v2292_v34 = vpop.f32.mrb[120].mxu0 }
 0x1d5   : > { %v2071_v26 = vpop.f32.mrb[120].mxu1  ;;  %v2617_v13 = vadd.f32 %v4178_v41, %v2292_v34  ;;  %v3370_v37 = vpop.f32.mrb[121].mxu0 }
 0x1d6   : > { %v3326_v27 = vpop.f32.mrb[121].mxu1  ;;  %v2400_v36 = vpop.permute.xlu1 %2399  ;;  %2489 = vrot.lane.b32.xlu0 %v2071_v26, %s3555_s23 }
 0x1d7   : > { %v2074_v60 = vpop.f32.mrb[122].mxu1  ;;  %v2402_v40 = vpop.permute.xlu0 %2401  ;;  %2653 = vst.msk [vmem:[%s4184_s18 + $0x108] sm:$0xff] %vm2515_vm7, %v2617_v13 }
 0x1d8   : > { %v3327_v10 = vpop.f32.mrb[123].mxu1  ;;  %2491 = vrot.lane.b32.xlu1 %v2074_v60, %s3555_s23  ;;  %v2295_v18 = vpop.f32.mrb[122].mxu0 }
 0x1d9   : > { %v2619_v30 = vadd.f32 %v4178_v41, %v2295_v18  ;;  %v3371_v44 = vpop.f32.mrb[123].mxu0 }
 0x1da   : > { %v2324_v61 = vpop.permute.xlu1 %2323 }
 0x1db   : > { %v2519_v46 = vsel %vm2515_vm7, %v4041_v23, %v2324_v61  ;;  %v2326_v31 = vpop.permute.xlu0 %2325  ;;  %2655 = vst.msk [vmem:[%s4184_s18 + $0x118] sm:$0xff] %vm2515_vm7, %v2619_v30 }
 0x1dc   : > { %v4277_v47 = vsel %vm2534_vm8, %v2519_v46, %v2396_v11  ;;  %v2520_v55 = vsel %vm2515_vm7, %v4052_v28, %v2326_v31 }
 0x1dd   : > { %v2079_v49 = vpop.f32.mrb[124].mxu1  ;;  %v4285_v41 = vsel %vm2534_vm8, %v2520_v55, %v2398_v24 }
 0x1de   : > { %v3330_v50 = vpop.f32.mrb[125].mxu1  ;;  %v2404_v51 = vpop.permute.xlu1 %2403  ;;  %2493 = vrot.lane.b32.xlu0 %v2079_v49, %s3555_s23 }
 0x1df   : > { %v2082_v32 = vpop.f32.mrb[126].mxu1  ;;  %v2406_v23 = vpop.permute.xlu0 %2405 }
 0x1e0   : > { %v3331_v56 = vpop.f32.mrb[127].mxu1  ;;  %2495 = vrot.lane.b32.xlu1 %v2082_v32, %s3555_s23 }
 0x1e2   : > { %v2328_v5 = vpop.permute.xlu1 %2327 }
 0x1e3   : > { %v2521_v57 = vsel %vm2515_vm7, %v4057_v33, %v2328_v5  ;;  %v2330_v58 = vpop.permute.xlu0 %2329 }
 0x1e4   : > { %v4291_v28 = vsel %vm2534_vm8, %v2521_v57, %v2400_v36  ;;  %v2522_v59 = vsel %vm2515_vm7, %v4068_v38, %v2330_v58 }
 0x1e5   : > { %v4296_v11 = vsel %vm2534_vm8, %v2522_v59, %v2402_v40 }
 0x1e6   : > { %v2408_v52 = vpop.permute.xlu1 %2407 }
 0x1e7   : > { %v2410_v1 = vpop.permute.xlu0 %2409 }
 0x1ea   : > { %v2332_v62 = vpop.permute.xlu1 %2331 }
 0x1eb   : > { %v2523_v12 = vsel %vm2515_vm7, %v4073_v43, %v2332_v62  ;;  %v2334_v63 = vpop.permute.xlu0 %2333 }
 0x1ec   : > { %v4301_v54 = vsel %vm2534_vm8, %v2523_v12, %v2404_v51  ;;  %v2524_v33 = vsel %vm2515_vm7, %v4022_v9, %v2334_v63 }
 0x1ed   : > { %v4306_v6 = vsel %vm2534_vm8, %v2524_v33, %v2406_v23 }
 0x1ee   : > { %v2412_v4 = vpop.permute.xlu1 %2411 }
 0x1ef   : > { %v2414_v38 = vpop.permute.xlu0 %2413 }
 0x1f2   : > { %v2336_v14 = vpop.permute.xlu1 %2335 }
 0x1f3   : > { %v2525_v16 = vsel %vm2515_vm7, %v4028_v15, %v2336_v14  ;;  %v2338_v2 = vpop.permute.xlu0 %2337 }
 0x1f4   : > { %v4311_v8 = vsel %vm2534_vm8, %v2525_v16, %v2408_v52  ;;  %v2526_v43 = vsel %vm2515_vm7, %v4038_v19, %v2338_v2 }
 0x1f5   : > { %v4316_v20 = vsel %vm2534_vm8, %v2526_v43, %v2410_v1 }
 0x1f6   : > { %v2416_v42 = vpop.permute.xlu1 %2415 }
 0x1f7   : > { %v2418_v9 = vpop.permute.xlu0 %2417 }
 0x1fa   : > { %v2340_v21 = vpop.permute.xlu1 %2339 }
 0x1fb   : > { %v2527_v3 = vsel %vm2515_vm7, %v4044_v25, %v2340_v21  ;;  %v2342_v24 = vpop.permute.xlu0 %2341 }
 0x1fc   : > { %v4321_v26 = vsel %vm2534_vm8, %v2527_v3, %v2412_v4  ;;  %v2528_v15 = vsel %vm2515_vm7, %v4054_v29, %v2342_v24 }
 0x1fd   : > { %v4326_v27 = vsel %vm2534_vm8, %v2528_v15, %v2414_v38 }
 0x1fe   : > { %v2420_v34 = vpop.permute.xlu1 %2419 }
 0x1ff   : > { %v2422_v19 = vpop.permute.xlu0 %2421 }
 0x202   : > { %v2344_v36 = vpop.permute.xlu1 %2343 }
 0x203   : > { %v2529_v13 = vsel %vm2515_vm7, %v4060_v35, %v2344_v36  ;;  %v2346_v60 = vpop.permute.xlu0 %2345 }
 0x204   : > { %v4331_v37 = vsel %vm2534_vm8, %v2529_v13, %v2416_v42  ;;  %v2530_v25 = vsel %vm2515_vm7, %v4070_v39, %v2346_v60 }
 0x205   : > { %v4336_v40 = vsel %vm2534_vm8, %v2530_v25, %v2418_v9 }
 0x206   : > { %v2424_v10 = vpop.permute.xlu1 %2423 }
 0x20a   : > { %v2348_v29 = vpop.permute.xlu1 %2347  ;;  %v2350_v18 = vpop.permute.xlu0 %2349 }
 0x20b   : > { %v2531_v61 = vsel %vm2515_vm7, %v4076_v45, %v2348_v29  ;;  %v2532_v35 = vsel %vm2515_vm7, %v4082_v48, %v2350_v18 }
 0x20c   : > { %v4343_v30 = vsel %vm2534_vm8, %v2531_v61, %v2420_v34  ;;  %v4346_v44 = vsel %vm2534_vm8, %v2532_v35, %v2422_v19 }
 0x20e   : > { %v2352_v39 = vpop.permute.xlu1 %2351 }
 0x20f   : > { %v2533_v46 = vsel %vm2515_vm7, %v4085_v53, %v2352_v39 }
 0x210   : > { %v2462_v31 = vpop.permute.xlu0 %2461  ;;  %v4351_v55 = vsel %vm2534_vm8, %v2533_v46, %v2424_v10 }
 0x211   : > { %v2554_v45 = vsel %vm2553_vm9, %v4249_v0, %v2462_v31 }
 0x212   : > { %v2584_v48 = vadd.f32 %v4174_v17, %v2554_v45  ;;  %v2464_v49 = vpop.permute.xlu1 %2463 }
 0x213   : > { %v2555_v50 = vsel %vm2553_vm9, %v4259_v22, %v2464_v49 }
 0x214   : > { %2620 = vst [vmem:[%s4184_s18] sm:$0xff] %v2584_v48  ;;  %v2586_v51 = vadd.f32 %v4174_v17, %v2555_v50 }
 0x216   : > { %2622 = vst [vmem:[%s4184_s18 + $0x10] sm:$0xff] %v2586_v51 }
 0x218   : > { %v2466_v53 = vpop.permute.xlu0 %2465 }
 0x219   : > { %v2556_v32 = vsel %vm2553_vm9, %v4266_v7, %v2466_v53 }
 0x21a   : > { %v2588_v56 = vadd.f32 %v4174_v17, %v2556_v32  ;;  %v2468_v23 = vpop.permute.xlu1 %2467 }
 0x21b   : > { %v2557_v0 = vsel %vm2553_vm9, %v4277_v47, %v2468_v23 }
 0x21c   : > { %2624 = vst [vmem:[%s4184_s18 + $0x20] sm:$0xff] %v2588_v56  ;;  %v2590_v22 = vadd.f32 %v4174_v17, %v2557_v0 }
 0x21e   : > { %2626 = vst [vmem:[%s4184_s18 + $0x30] sm:$0xff] %v2590_v22 }
 0x220   : > { %v2470_v5 = vpop.permute.xlu0 %2469 }
 0x221   : > { %v2558_v57 = vsel %vm2553_vm9, %v4285_v41, %v2470_v5 }
 0x222   : > { %v2592_v58 = vadd.f32 %v4174_v17, %v2558_v57  ;;  %v2472_v59 = vpop.permute.xlu1 %2471 }
 0x223   : > { %v2559_v7 = vsel %vm2553_vm9, %v4291_v28, %v2472_v59 }
 0x224   : > { %2628 = vst [vmem:[%s4184_s18 + $0x40] sm:$0xff] %v2592_v58  ;;  %v2594_v47 = vadd.f32 %v4174_v17, %v2559_v7 }
 0x226   : > { %2630 = vst [vmem:[%s4184_s18 + $0x50] sm:$0xff] %v2594_v47 }
 0x228   : > { %v2474_v52 = vpop.permute.xlu0 %2473 }
 0x229   : > { %v2560_v1 = vsel %vm2553_vm9, %v4296_v11, %v2474_v52 }
 0x22a   : > { %v2596_v62 = vadd.f32 %v4174_v17, %v2560_v1  ;;  %v2476_v12 = vpop.permute.xlu1 %2475 }
 0x22b   : > { %v2561_v41 = vsel %vm2553_vm9, %v4301_v54, %v2476_v12 }
 0x22c   : > { %2632 = vst [vmem:[%s4184_s18 + $0x60] sm:$0xff] %v2596_v62  ;;  %v2598_v28 = vadd.f32 %v4174_v17, %v2561_v41 }
 0x22e   : > { %2634 = vst [vmem:[%s4184_s18 + $0x70] sm:$0xff] %v2598_v28 }
 0x230   : > { %v2478_v63 = vpop.permute.xlu0 %2477 }
 0x231   : > { %v2562_v33 = vsel %vm2553_vm9, %v4306_v6, %v2478_v63 }
 0x232   : > { %v2600_v4 = vadd.f32 %v4174_v17, %v2562_v33  ;;  %v2480_v38 = vpop.permute.xlu1 %2479 }
 0x233   : > { %v2563_v11 = vsel %vm2553_vm9, %v4311_v8, %v2480_v38 }
 0x234   : > { %2636 = vst [vmem:[%s4184_s18 + $0x80] sm:$0xff] %v2600_v4  ;;  %v2602_v54 = vadd.f32 %v4174_v17, %v2563_v11 }
 0x236   : > { %2638 = vst [vmem:[%s4184_s18 + $0x90] sm:$0xff] %v2602_v54 }
 0x238   : > { %v2482_v14 = vpop.permute.xlu0 %2481 }
 0x239   : > { %v2564_v16 = vsel %vm2553_vm9, %v4316_v20, %v2482_v14 }
 0x23a   : > { %v2604_v2 = vadd.f32 %v4174_v17, %v2564_v16  ;;  %v2484_v43 = vpop.permute.xlu1 %2483 }
 0x23b   : > { %v2565_v6 = vsel %vm2553_vm9, %v4321_v26, %v2484_v43 }
 0x23c   : > { %2640 = vst [vmem:[%s4184_s18 + $0xa0] sm:$0xff] %v2604_v2  ;;  %v2606_v8 = vadd.f32 %v4174_v17, %v2565_v6 }
 0x23e   : > { %2642 = vst [vmem:[%s4184_s18 + $0xb0] sm:$0xff] %v2606_v8 }
 0x240   : > { %v2486_v42 = vpop.permute.xlu0 %2485 }
 0x241   : > { %v2566_v9 = vsel %vm2553_vm9, %v4326_v27, %v2486_v42 }
 0x242   : > { %v2608_v21 = vadd.f32 %v4174_v17, %v2566_v9  ;;  %v2488_v3 = vpop.permute.xlu1 %2487 }
 0x243   : > { %v2567_v20 = vsel %vm2553_vm9, %v4331_v37, %v2488_v3 }
 0x244   : > { %2644 = vst [vmem:[%s4184_s18 + $0xc0] sm:$0xff] %v2608_v21  ;;  %v2610_v24 = vadd.f32 %v4174_v17, %v2567_v20 }
 0x246   : > { %2646 = vst [vmem:[%s4184_s18 + $0xd0] sm:$0xff] %v2610_v24 }
 0x248   : > { %v2490_v26 = vpop.permute.xlu0 %2489 }
 0x249   : > { %v2568_v15 = vsel %vm2553_vm9, %v4336_v40, %v2490_v26 }
 0x24a   : > { %v2612_v34 = vadd.f32 %v4174_v17, %v2568_v15  ;;  %v2492_v19 = vpop.permute.xlu1 %2491 }
 0x24b   : > { %v2569_v27 = vsel %vm2553_vm9, %v4343_v30, %v2492_v19 }
 0x24c   : > { %2648 = vst [vmem:[%s4184_s18 + $0xe0] sm:$0xff] %v2612_v34  ;;  %v2614_v36 = vadd.f32 %v4174_v17, %v2569_v27 }
 0x24e   : > { %2650 = vst [vmem:[%s4184_s18 + $0xf0] sm:$0xff] %v2614_v36 }
 0x250   : > { %v2494_v13 = vpop.permute.xlu0 %2493 }
 0x251   : > { %v2570_v60 = vsel %vm2553_vm9, %v4346_v44, %v2494_v13 }
 0x252   : > { %v2616_v37 = vadd.f32 %v4174_v17, %v2570_v60  ;;  %v2496_v25 = vpop.permute.xlu1 %2495 }
 0x253   : > { %v2571_v10 = vsel %vm2553_vm9, %v4351_v55, %v2496_v25 }
 0x254   : > { %2652 = vst [vmem:[%s4184_s18 + $0x100] sm:$0xff] %v2616_v37  ;;  %v2618_v40 = vadd.f32 %v4174_v17, %v2571_v10 }
 0x256   : > { %2654 = vst [vmem:[%s4184_s18 + $0x110] sm:$0xff] %v2618_v40 }
 0x257 PF: > { %s21_s17 = sadd.s32 1, %s3547_s17  }
 0x258   : > { %p18_p4 = scmp.ge.s32.totalorder %s21_s17, 4  }
 0x25a   :  { %20 = sbr.rel (!%p18_p4) target bundleno = 1 (0x1), region = 106 }

</bundles_post_ra>
